<compile_context>
chip_gen: v6e
topology: v6e:2x2x1
jax: 0.10.0
libtpu: 0.0.40
codegen_flags: <defaults>
</compile_context>

<pallas_src>
import jax
import jax.numpy as jnp
import numpy as np
from jax import lax
from jax.experimental import pallas as pl
from jax.experimental.pallas import tpu as pltpu


def _in_res_block_kernel(x_ref, t_ref, rowsel_ref, wb1_ref, b1_ref,
                         wb2_ref, b2_ref, gamma_ref, beta_ref,
                         gath_ref, scat_ref, out_ref, res_ref, hbuf_ref):
    f32 = jnp.float32
    NH, WCout = out_ref.shape          # N*H rows, W*Cout lanes
    N = rowsel_ref.shape[1]
    H = NH // N
    Cout = gath_ref.shape[1]
    W = WCout // Cout

    def mm(a, b):
        return jnp.dot(a, b, preferred_element_type=f32)

    # Row masks: vertical taps that cross an image boundary contribute zero.
    hpos = lax.broadcasted_iota(jnp.int32, (NH, 1), 0) % H
    not_top = hpos != 0            # row h-1 invalid when h == 0
    not_bot = hpos != H - 1        # row h+1 invalid when h == H-1

    # ---- conv1: 3 banded matmuls (ky = 0,1,2) on the lane-dense view -------
    # x_ref is (N*H + 2, W*Cin) with a zero halo row at top and bottom.
    x_mid = x_ref[1:NH + 1, :]
    x_up = jnp.where(not_top, x_ref[0:NH, :], 0.0)       # row h-1
    x_dn = jnp.where(not_bot, x_ref[2:NH + 2, :], 0.0)   # row h+1
    c1 = (mm(x_up, wb1_ref[0]) + mm(x_mid, wb1_ref[1]) + mm(x_dn, wb1_ref[2])
          + b1_ref[...])

    # PyTorch aliasing: `res = x; x += t`  =>  res == conv1(x) + t
    t_rows = mm(rowsel_ref[...], t_ref[...])              # broadcast t over H
    res = c1 + t_rows
    res_ref[...] = res

    h = jnp.where(res > 0, res, 0.2 * res)                # LeakyReLU(0.2)

    # ---- conv2: same scheme; stage h once, zero only the 2 halo rows -------
    hbuf_ref[0:1, :] = jnp.zeros((1, WCout), f32)
    hbuf_ref[NH + 1:NH + 2, :] = jnp.zeros((1, WCout), f32)
    hbuf_ref[1:NH + 1, :] = h
    h_up = jnp.where(not_top, hbuf_ref[0:NH, :], 0.0)
    h_dn = jnp.where(not_bot, hbuf_ref[2:NH + 2, :], 0.0)
    y = (mm(h_up, wb2_ref[0]) + mm(h, wb2_ref[1]) + mm(h_dn, wb2_ref[2])
         + b2_ref[...] + res)
    y = jnp.where(y > 0, y, 0.2 * y)                      # LeakyReLU(0.2)

    # ---- BatchNorm2d (training-mode biased batch stats), one fused sweep ---
    inv_cnt = 1.0 / float(NH * W)                         # 1 / (N*H*W)
    lane_sum = jnp.sum(y, axis=0, keepdims=True)          # (1, W*Cout)
    lane_ssq = jnp.sum(y * y, axis=0, keepdims=True)
    ch_sum = mm(lane_sum, gath_ref[...])                  # (1, Cout)
    ch_ssq = mm(lane_ssq, gath_ref[...])
    mean = ch_sum * inv_cnt
    var = ch_ssq * inv_cnt - mean * mean
    inv = lax.rsqrt(var + 1e-5)
    scale_c = gamma_ref[...] * inv                        # (1, Cout)
    shift_c = beta_ref[...] - mean * scale_c
    scale_l = mm(scale_c, scat_ref[...])                  # (1, W*Cout)
    shift_l = mm(shift_c, scat_ref[...])
    out_ref[...] = y * scale_l + shift_l


def _band_weights(w_oihw, W):
    """3x3 OIHW conv weight -> 3 banded matmul weights (3, W*Cin, W*Cout).

    band[ky][w_in*Cin + c_in, w_out*Cout + c_out] =
        w[c_out, c_in, ky, w_in - w_out + 1]  if that kx is in {0,1,2} else 0,
    so a single (rows, W*Cin) @ band matmul does the horizontal taps + channel
    contraction (with implicit horizontal zero padding).
    """
    Cout, Cin = int(w_oihw.shape[0]), int(w_oihw.shape[1])
    bands = []
    for ky in range(3):
        B = jnp.zeros((W, Cin, W, Cout), jnp.float32)
        for kx in range(3):
            S = jnp.eye(W, k=1 - kx, dtype=jnp.float32)   # S[w_in,w_out]: w_in = w_out+kx-1
            K = jnp.transpose(w_oihw[:, :, ky, kx]).astype(jnp.float32)  # (Cin, Cout)
            B = B + S[:, None, :, None] * K[None, :, None, :]
        bands.append(B.reshape(W * Cin, W * Cout))
    return jnp.stack(bands, axis=0)


def in_res_block(x_nchw, t_nc11, w1_oihw, b1, w2_oihw, b2, gamma, beta):
    """x: (N, Cin, H, W), t: (N, Cout, 1, 1). Returns (out, res), both NCHW."""
    N, Cin, H, W = x_nchw.shape
    Cout = int(b1.shape[0])
    NH, WCin, WCout = N * H, W * Cin, W * Cout
    f32 = jnp.float32

    # NCHW -> lane-dense (N*H, W*Cin) + one zero halo row top/bottom (H-pad only).
    x2d = jnp.transpose(x_nchw, (0, 2, 3, 1)).reshape(NH, WCin).astype(f32)
    x2d = jnp.pad(x2d, ((1, 1), (0, 0)))

    # t: (N,Cout,1,1) -> lane-tiled (N, W*Cout); row broadcast happens in-kernel.
    t2d = jnp.tile(t_nc11.reshape(N, Cout).astype(f32), (1, W))
    rowsel = jnp.repeat(jnp.eye(N, dtype=f32), H, axis=0)            # (N*H, N)

    wb1 = _band_weights(w1_oihw, W)                                  # (3, W*Cin, W*Cout)
    wb2 = _band_weights(w2_oihw, W)                                  # (3, W*Cout, W*Cout)
    b1l = jnp.tile(b1.reshape(1, Cout).astype(f32), (1, W))          # (1, W*Cout)
    b2l = jnp.tile(b2.reshape(1, Cout).astype(f32), (1, W))
    gath = jnp.tile(jnp.eye(Cout, dtype=f32), (W, 1))                # (W*Cout, Cout)
    scat = gath.T                                                    # (Cout, W*Cout)

    vmem = pl.BlockSpec(memory_space=pltpu.MemorySpace.VMEM)
    flops = 2 * NH * 3 * (WCin * WCout + WCout * WCout)
    bytes_accessed = 4 * ((NH + 2) * WCin + N * WCout + NH * N
                          + 3 * (WCin + WCout) * WCout + 2 * NH * WCout)

    out2d, res2d = pl.pallas_call(
        _in_res_block_kernel,
        out_shape=(jax.ShapeDtypeStruct((NH, WCout), f32),
                   jax.ShapeDtypeStruct((NH, WCout), f32)),
        in_specs=[vmem] * 11,
        out_specs=(vmem, vmem),
        scratch_shapes=[pltpu.VMEM((NH + 2, WCout), f32)],
        compiler_params=pltpu.CompilerParams(vmem_limit_bytes=32 * 1024 * 1024),
        cost_estimate=pl.CostEstimate(flops=flops, transcendentals=Cout,
                                      bytes_accessed=bytes_accessed),
    )(x2d, t2d, rowsel, wb1, b1l, wb2, b2l,
      gamma.reshape(1, Cout).astype(f32), beta.reshape(1, Cout).astype(f32),
      gath, scat)

    out = jnp.transpose(out2d.reshape(N, H, W, Cout), (0, 3, 1, 2))
    res = jnp.transpose(res2d.reshape(N, H, W, Cout), (0, 3, 1, 2))
    return out, res


def _ref_forward(x, t, w1, b1, w2, b2, gamma, beta):
    """Plain-JAX reference (NCHW) for correctness checking."""
    dn = ('NCHW', 'OIHW', 'NCHW')
    c1 = lax.conv_general_dilated(x, w1, (1, 1), 'SAME',
                                  dimension_numbers=dn) + b1[None, :, None, None]
    res = c1 + t
    h = jnp.where(res > 0, res, 0.2 * res)
    c2 = lax.conv_general_dilated(h, w2, (1, 1), 'SAME',
                                  dimension_numbers=dn) + b2[None, :, None, None]
    y = c2 + res
    y = jnp.where(y > 0, y, 0.2 * y)
    mean = y.mean(axis=(0, 2, 3), keepdims=True)
    var = ((y - mean) ** 2).mean(axis=(0, 2, 3), keepdims=True)
    out = (y - mean) / jnp.sqrt(var + 1e-5) * gamma[None, :, None, None] \
        + beta[None, :, None, None]
    return out, res


if __name__ == "__main__":
    N, Cin, Cout, H, W = 2, 4, 8, 16, 16

    key = jax.random.PRNGKey(0)
    kx, kt, kw1, kb1, kw2, kb2 = jax.random.split(key, 6)

    x = jax.random.normal(kx, (N, Cin, H, W), jnp.float32)
    t = jax.random.normal(kt, (N, Cout, 1, 1), jnp.float32)

    w1 = jax.random.normal(kw1, (Cout, Cin, 3, 3), jnp.float32) * 0.1
    b1 = jax.random.normal(kb1, (Cout,), jnp.float32) * 0.1
    w2 = jax.random.normal(kw2, (Cout, Cout, 3, 3), jnp.float32) * 0.1
    b2 = jax.random.normal(kb2, (Cout,), jnp.float32) * 0.1
    gamma = jnp.ones((Cout,), jnp.float32)     # BatchNorm2d weight init
    beta = jnp.zeros((Cout,), jnp.float32)     # BatchNorm2d bias init

    out, res = jax.jit(in_res_block)(x, t, w1, b1, w2, b2, gamma, beta)
    out = jax.block_until_ready(out)
    res = jax.block_until_ready(res)

    out_ref, res_ref = _ref_forward(x, t, w1, b1, w2, b2, gamma, beta)
    np.testing.assert_allclose(np.asarray(res), np.asarray(res_ref),
                               rtol=1e-4, atol=1e-4)
    np.testing.assert_allclose(np.asarray(out), np.asarray(out_ref),
                               rtol=1e-4, atol=1e-4)

    print("KERNEL_OK")
</pallas_src>

<mosaic_0001>
module attributes {stable_mosaic.version = 11 : i64} {
  func.func @_in_res_block_kernel(%arg0: memref<34x64xf32, #tpu.memory_space<vmem>>, %arg1: memref<2x128xf32, #tpu.memory_space<vmem>>, %arg2: memref<32x2xf32, #tpu.memory_space<vmem>>, %arg3: memref<3x64x128xf32, #tpu.memory_space<vmem>>, %arg4: memref<1x128xf32, #tpu.memory_space<vmem>>, %arg5: memref<3x128x128xf32, #tpu.memory_space<vmem>>, %arg6: memref<1x128xf32, #tpu.memory_space<vmem>>, %arg7: memref<1x8xf32, #tpu.memory_space<vmem>>, %arg8: memref<1x8xf32, #tpu.memory_space<vmem>>, %arg9: memref<128x8xf32, #tpu.memory_space<vmem>>, %arg10: memref<8x128xf32, #tpu.memory_space<vmem>>, %arg11: memref<32x128xf32, #tpu.memory_space<vmem>>, %arg12: memref<32x128xf32, #tpu.memory_space<vmem>>, %arg13: memref<34x128xf32, #tpu.memory_space<vmem>>) attributes {dimension_semantics = [], scalar_prefetch = 0 : i64, scratch_operands = 1 : i64, tpu.core_type = #tpu.core_type<tc>} {
    %0 = tpu.iota {dimensions = array<i32: 0>} : vector<32x1xi32>
    %c16_i32 = arith.constant 16 : i32
    %c0_i32 = arith.constant 0 : i32
    %1 = arith.cmpi eq, %c16_i32, %c0_i32 : i32
    %c1_i32 = arith.constant 1 : i32
    %2 = arith.select %1, %c1_i32, %c16_i32 : i32
    %3 = vector.broadcast %2 : i32 to vector<32x1xi32>
    %4 = arith.remsi %0, %3 : vector<32x1xi32>
    %c0_i32_0 = arith.constant 0 : i32
    %5 = vector.broadcast %c0_i32_0 : i32 to vector<32x1xi32>
    %6 = arith.cmpi ne, %4, %5 : vector<32x1xi32>
    %c0_i32_1 = arith.constant 0 : i32
    %7 = vector.broadcast %c0_i32_1 : i32 to vector<32x1xi32>
    %8 = arith.cmpi slt, %4, %7 : vector<32x1xi32>
    %c0_i32_2 = arith.constant 0 : i32
    %9 = arith.cmpi slt, %2, %c0_i32_2 : i32
    %10 = vector.broadcast %9 : i1 to vector<32x1xi1>
    %11 = vector.broadcast %10 : vector<32x1xi1> to vector<32x1xi1>
    %12 = arith.xori %8, %11 : vector<32x1xi1>
    %13 = arith.andi %12, %6 : vector<32x1xi1>
    %14 = vector.broadcast %2 : i32 to vector<32x1xi32>
    %15 = arith.addi %4, %14 : vector<32x1xi32>
    %16 = arith.select %13, %15, %4 : vector<32x1xi1>, vector<32x1xi32>
    %c0_i32_3 = arith.constant 0 : i32
    %17 = vector.broadcast %c0_i32_3 : i32 to vector<32x1xi32>
    %18 = arith.cmpi ne, %16, %17 : vector<32x1xi32>
    %c15_i32 = arith.constant 15 : i32
    %19 = vector.broadcast %c15_i32 : i32 to vector<32x1xi32>
    %20 = arith.cmpi ne, %16, %19 : vector<32x1xi32>
    %c1 = arith.constant 1 : index
    %c0 = arith.constant 0 : index
    %21 = vector.load %arg0[%c1, %c0] : memref<34x64xf32, #tpu.memory_space<vmem>>, vector<32x64xf32>
    %c0_4 = arith.constant 0 : index
    %c0_5 = arith.constant 0 : index
    %22 = vector.load %arg0[%c0_4, %c0_5] : memref<34x64xf32, #tpu.memory_space<vmem>>, vector<32x64xf32>
    %cst = arith.constant 0.000000e+00 : f32
    %23 = vector.shape_cast %18 : vector<32x1xi1> to vector<32x1xi1>
    %24 = vector.broadcast %23 : vector<32x1xi1> to vector<32x64xi1>
    %25 = vector.broadcast %cst : f32 to vector<32x64xf32>
    %26 = arith.select %24, %22, %25 : vector<32x64xi1>, vector<32x64xf32>
    %c2 = arith.constant 2 : index
    %c0_6 = arith.constant 0 : index
    %27 = vector.load %arg0[%c2, %c0_6] : memref<34x64xf32, #tpu.memory_space<vmem>>, vector<32x64xf32>
    %cst_7 = arith.constant 0.000000e+00 : f32
    %28 = vector.shape_cast %20 : vector<32x1xi1> to vector<32x1xi1>
    %29 = vector.broadcast %28 : vector<32x1xi1> to vector<32x64xi1>
    %30 = vector.broadcast %cst_7 : f32 to vector<32x64xf32>
    %31 = arith.select %29, %27, %30 : vector<32x64xi1>, vector<32x64xf32>
    %c0_8 = arith.constant 0 : index
    %c0_9 = arith.constant 0 : index
    %c0_10 = arith.constant 0 : index
    %32 = vector.load %arg3[%c0_8, %c0_9, %c0_10] : memref<3x64x128xf32, #tpu.memory_space<vmem>>, vector<1x64x128xf32>
    %33 = vector.shape_cast %32 : vector<1x64x128xf32> to vector<64x128xf32>
    %cst_11 = arith.constant dense<0.000000e+00> : vector<32x128xf32>
    %34 = tpu.matmul %26, %33, %cst_11 {dimension_numbers = #tpu.dot_dimension_numbers<[1], [0], [0], [1], [0, 0, 1, 1], [], []>} : vector<32x64xf32>, vector<64x128xf32>, vector<32x128xf32> -> vector<32x128xf32>
    %c1_12 = arith.constant 1 : index
    %c0_13 = arith.constant 0 : index
    %c0_14 = arith.constant 0 : index
    %35 = vector.load %arg3[%c1_12, %c0_13, %c0_14] : memref<3x64x128xf32, #tpu.memory_space<vmem>>, vector<1x64x128xf32>
    %36 = vector.shape_cast %35 : vector<1x64x128xf32> to vector<64x128xf32>
    %cst_15 = arith.constant dense<0.000000e+00> : vector<32x128xf32>
    %37 = tpu.matmul %21, %36, %cst_15 {dimension_numbers = #tpu.dot_dimension_numbers<[1], [0], [0], [1], [0, 0, 1, 1], [], []>} : vector<32x64xf32>, vector<64x128xf32>, vector<32x128xf32> -> vector<32x128xf32>
    %38 = arith.addf %34, %37 : vector<32x128xf32>
    %c2_16 = arith.constant 2 : index
    %c0_17 = arith.constant 0 : index
    %c0_18 = arith.constant 0 : index
    %39 = vector.load %arg3[%c2_16, %c0_17, %c0_18] : memref<3x64x128xf32, #tpu.memory_space<vmem>>, vector<1x64x128xf32>
    %40 = vector.shape_cast %39 : vector<1x64x128xf32> to vector<64x128xf32>
    %cst_19 = arith.constant dense<0.000000e+00> : vector<32x128xf32>
    %41 = tpu.matmul %31, %40, %cst_19 {dimension_numbers = #tpu.dot_dimension_numbers<[1], [0], [0], [1], [0, 0, 1, 1], [], []>} : vector<32x64xf32>, vector<64x128xf32>, vector<32x128xf32> -> vector<32x128xf32>
    %42 = arith.addf %38, %41 : vector<32x128xf32>
    %c0_20 = arith.constant 0 : index
    %c0_21 = arith.constant 0 : index
    %43 = vector.load %arg4[%c0_20, %c0_21] : memref<1x128xf32, #tpu.memory_space<vmem>>, vector<1x128xf32>
    %44 = vector.broadcast %43 : vector<1x128xf32> to vector<32x128xf32>
    %45 = arith.addf %42, %44 : vector<32x128xf32>
    %c0_22 = arith.constant 0 : index
    %c0_23 = arith.constant 0 : index
    %46 = vector.load %arg2[%c0_22, %c0_23] : memref<32x2xf32, #tpu.memory_space<vmem>>, vector<32x2xf32>
    %c0_24 = arith.constant 0 : index
    %c0_25 = arith.constant 0 : index
    %47 = vector.load %arg1[%c0_24, %c0_25] : memref<2x128xf32, #tpu.memory_space<vmem>>, vector<2x128xf32>
    %cst_26 = arith.constant dense<0.000000e+00> : vector<32x128xf32>
    %48 = tpu.matmul %46, %47, %cst_26 {dimension_numbers = #tpu.dot_dimension_numbers<[1], [0], [0], [1], [0, 0, 1, 1], [], []>} : vector<32x2xf32>, vector<2x128xf32>, vector<32x128xf32> -> vector<32x128xf32>
    %49 = arith.addf %45, %48 : vector<32x128xf32>
    %c0_27 = arith.constant 0 : index
    %c0_28 = arith.constant 0 : index
    %50 = vector.load %arg12[%c0_27, %c0_28] : memref<32x128xf32, #tpu.memory_space<vmem>>, vector<32x128xf32>
    tpu.vector_store %arg12[%c0_27, %c0_28], %49 {strides = array<i32>} : memref<32x128xf32, #tpu.memory_space<vmem>>, vector<32x128xf32>,
    %cst_29 = arith.constant 0.000000e+00 : f32
    %51 = vector.broadcast %cst_29 : f32 to vector<32x128xf32>
    %52 = arith.cmpf ogt, %49, %51 : vector<32x128xf32>
    %cst_30 = arith.constant 2.000000e-01 : f32
    %53 = vector.broadcast %cst_30 : f32 to vector<32x128xf32>
    %54 = arith.mulf %53, %49 : vector<32x128xf32>
    %55 = arith.select %52, %49, %54 : vector<32x128xi1>, vector<32x128xf32>
    %cst_31 = arith.constant 0.000000e+00 : f32
    %56 = vector.broadcast %cst_31 : f32 to vector<1x128xf32>
    %c0_32 = arith.constant 0 : index
    %c0_33 = arith.constant 0 : index
    %57 = vector.load %arg13[%c0_32, %c0_33] : memref<34x128xf32, #tpu.memory_space<vmem>>, vector<1x128xf32>
    tpu.vector_store %arg13[%c0_32, %c0_33], %56 {strides = array<i32>} : memref<34x128xf32, #tpu.memory_space<vmem>>, vector<1x128xf32>,
    %cst_34 = arith.constant 0.000000e+00 : f32
    %58 = vector.broadcast %cst_34 : f32 to vector<1x128xf32>
    %c33 = arith.constant 33 : index
    %c0_35 = arith.constant 0 : index
    %59 = vector.load %arg13[%c33, %c0_35] : memref<34x128xf32, #tpu.memory_space<vmem>>, vector<1x128xf32>
    tpu.vector_store %arg13[%c33, %c0_35], %58 {strides = array<i32>} : memref<34x128xf32, #tpu.memory_space<vmem>>, vector<1x128xf32>,
    %c1_36 = arith.constant 1 : index
    %c0_37 = arith.constant 0 : index
    %60 = vector.load %arg13[%c1_36, %c0_37] : memref<34x128xf32, #tpu.memory_space<vmem>>, vector<32x128xf32>
    tpu.vector_store %arg13[%c1_36, %c0_37], %55 {strides = array<i32>} : memref<34x128xf32, #tpu.memory_space<vmem>>, vector<32x128xf32>,
    %c0_38 = arith.constant 0 : index
    %c0_39 = arith.constant 0 : index
    %61 = vector.load %arg13[%c0_38, %c0_39] : memref<34x128xf32, #tpu.memory_space<vmem>>, vector<32x128xf32>
    %cst_40 = arith.constant 0.000000e+00 : f32
    %62 = vector.shape_cast %18 : vector<32x1xi1> to vector<32x1xi1>
    %63 = vector.broadcast %62 : vector<32x1xi1> to vector<32x128xi1>
    %64 = vector.broadcast %cst_40 : f32 to vector<32x128xf32>
    %65 = arith.select %63, %61, %64 : vector<32x128xi1>, vector<32x128xf32>
    %c2_41 = arith.constant 2 : index
    %c0_42 = arith.constant 0 : index
    %66 = vector.load %arg13[%c2_41, %c0_42] : memref<34x128xf32, #tpu.memory_space<vmem>>, vector<32x128xf32>
    %cst_43 = arith.constant 0.000000e+00 : f32
    %67 = vector.shape_cast %20 : vector<32x1xi1> to vector<32x1xi1>
    %68 = vector.broadcast %67 : vector<32x1xi1> to vector<32x128xi1>
    %69 = vector.broadcast %cst_43 : f32 to vector<32x128xf32>
    %70 = arith.select %68, %66, %69 : vector<32x128xi1>, vector<32x128xf32>
    %c0_44 = arith.constant 0 : index
    %c0_45 = arith.constant 0 : index
    %c0_46 = arith.constant 0 : index
    %71 = vector.load %arg5[%c0_44, %c0_45, %c0_46] : memref<3x128x128xf32, #tpu.memory_space<vmem>>, vector<1x128x128xf32>
    %72 = vector.shape_cast %71 : vector<1x128x128xf32> to vector<128x128xf32>
    %cst_47 = arith.constant dense<0.000000e+00> : vector<32x128xf32>
    %73 = tpu.matmul %65, %72, %cst_47 {dimension_numbers = #tpu.dot_dimension_numbers<[1], [0], [0], [1], [0, 0, 1, 1], [], []>} : vector<32x128xf32>, vector<128x128xf32>, vector<32x128xf32> -> vector<32x128xf32>
    %c1_48 = arith.constant 1 : index
    %c0_49 = arith.constant 0 : index
    %c0_50 = arith.constant 0 : index
    %74 = vector.load %arg5[%c1_48, %c0_49, %c0_50] : memref<3x128x128xf32, #tpu.memory_space<vmem>>, vector<1x128x128xf32>
    %75 = vector.shape_cast %74 : vector<1x128x128xf32> to vector<128x128xf32>
    %cst_51 = arith.constant dense<0.000000e+00> : vector<32x128xf32>
    %76 = tpu.matmul %55, %75, %cst_51 {dimension_numbers = #tpu.dot_dimension_numbers<[1], [0], [0], [1], [0, 0, 1, 1], [], []>} : vector<32x128xf32>, vector<128x128xf32>, vector<32x128xf32> -> vector<32x128xf32>
    %77 = arith.addf %73, %76 : vector<32x128xf32>
    %c2_52 = arith.constant 2 : index
    %c0_53 = arith.constant 0 : index
    %c0_54 = arith.constant 0 : index
    %78 = vector.load %arg5[%c2_52, %c0_53, %c0_54] : memref<3x128x128xf32, #tpu.memory_space<vmem>>, vector<1x128x128xf32>
    %79 = vector.shape_cast %78 : vector<1x128x128xf32> to vector<128x128xf32>
    %cst_55 = arith.constant dense<0.000000e+00> : vector<32x128xf32>
    %80 = tpu.matmul %70, %79, %cst_55 {dimension_numbers = #tpu.dot_dimension_numbers<[1], [0], [0], [1], [0, 0, 1, 1], [], []>} : vector<32x128xf32>, vector<128x128xf32>, vector<32x128xf32> -> vector<32x128xf32>
    %81 = arith.addf %77, %80 : vector<32x128xf32>
    %c0_56 = arith.constant 0 : index
    %c0_57 = arith.constant 0 : index
    %82 = vector.load %arg6[%c0_56, %c0_57] : memref<1x128xf32, #tpu.memory_space<vmem>>, vector<1x128xf32>
    %83 = vector.broadcast %82 : vector<1x128xf32> to vector<32x128xf32>
    %84 = arith.addf %81, %83 : vector<32x128xf32>
    %85 = arith.addf %84, %49 : vector<32x128xf32>
    %cst_58 = arith.constant 0.000000e+00 : f32
    %86 = vector.broadcast %cst_58 : f32 to vector<32x128xf32>
    %87 = arith.cmpf ogt, %85, %86 : vector<32x128xf32>
    %cst_59 = arith.constant 2.000000e-01 : f32
    %88 = vector.broadcast %cst_59 : f32 to vector<32x128xf32>
    %89 = arith.mulf %88, %85 : vector<32x128xf32>
    %90 = arith.select %87, %85, %89 : vector<32x128xi1>, vector<32x128xf32>
    %cst_60 = arith.constant dense<0.000000e+00> : vector<128xf32>
    %91 = vector.multi_reduction <add>, %90, %cst_60 [0] : vector<32x128xf32> to vector<128xf32>
    %92 = vector.shape_cast %91 : vector<128xf32> to vector<1x128xf32>
    %93 = arith.mulf %90, %90 : vector<32x128xf32>
    %cst_61 = arith.constant dense<0.000000e+00> : vector<128xf32>
    %94 = vector.multi_reduction <add>, %93, %cst_61 [0] : vector<32x128xf32> to vector<128xf32>
    %95 = vector.shape_cast %94 : vector<128xf32> to vector<1x128xf32>
    %c0_62 = arith.constant 0 : index
    %c0_63 = arith.constant 0 : index
    %96 = vector.load %arg9[%c0_62, %c0_63] : memref<128x8xf32, #tpu.memory_space<vmem>>, vector<128x8xf32>
    %cst_64 = arith.constant dense<0.000000e+00> : vector<1x8xf32>
    %97 = tpu.matmul %92, %96, %cst_64 {dimension_numbers = #tpu.dot_dimension_numbers<[1], [0], [0], [1], [0, 0, 1, 1], [], []>} : vector<1x128xf32>, vector<128x8xf32>, vector<1x8xf32> -> vector<1x8xf32>
    %c0_65 = arith.constant 0 : index
    %c0_66 = arith.constant 0 : index
    %98 = vector.load %arg9[%c0_65, %c0_66] : memref<128x8xf32, #tpu.memory_space<vmem>>, vector<128x8xf32>
    %cst_67 = arith.constant dense<0.000000e+00> : vector<1x8xf32>
    %99 = tpu.matmul %95, %98, %cst_67 {dimension_numbers = #tpu.dot_dimension_numbers<[1], [0], [0], [1], [0, 0, 1, 1], [], []>} : vector<1x128xf32>, vector<128x8xf32>, vector<1x8xf32> -> vector<1x8xf32>
    %cst_68 = arith.constant 0.001953125 : f32
    %100 = vector.broadcast %cst_68 : f32 to vector<1x8xf32>
    %101 = arith.mulf %97, %100 : vector<1x8xf32>
    %cst_69 = arith.constant 0.001953125 : f32
    %102 = vector.broadcast %cst_69 : f32 to vector<1x8xf32>
    %103 = arith.mulf %99, %102 : vector<1x8xf32>
    %104 = arith.mulf %101, %101 : vector<1x8xf32>
    %105 = arith.subf %103, %104 : vector<1x8xf32>
    %cst_70 = arith.constant 9.99999974E-6 : f32
    %106 = vector.broadcast %cst_70 : f32 to vector<1x8xf32>
    %107 = arith.addf %105, %106 : vector<1x8xf32>
    %108 = math.rsqrt %107 : vector<1x8xf32>
    %c0_71 = arith.constant 0 : index
    %c0_72 = arith.constant 0 : index
    %109 = vector.load %arg7[%c0_71, %c0_72] : memref<1x8xf32, #tpu.memory_space<vmem>>, vector<1x8xf32>
    %110 = arith.mulf %109, %108 : vector<1x8xf32>
    %c0_73 = arith.constant 0 : index
    %c0_74 = arith.constant 0 : index
    %111 = vector.load %arg8[%c0_73, %c0_74] : memref<1x8xf32, #tpu.memory_space<vmem>>, vector<1x8xf32>
    %112 = arith.mulf %101, %110 : vector<1x8xf32>
    %113 = arith.subf %111, %112 : vector<1x8xf32>
    %c0_75 = arith.constant 0 : index
    %c0_76 = arith.constant 0 : index
    %114 = vector.load %arg10[%c0_75, %c0_76] : memref<8x128xf32, #tpu.memory_space<vmem>>, vector<8x128xf32>
    %cst_77 = arith.constant dense<0.000000e+00> : vector<1x128xf32>
    %115 = tpu.matmul %110, %114, %cst_77 {dimension_numbers = #tpu.dot_dimension_numbers<[1], [0], [0], [1], [0, 0, 1, 1], [], []>} : vector<1x8xf32>, vector<8x128xf32>, vector<1x128xf32> -> vector<1x128xf32>
    %c0_78 = arith.constant 0 : index
    %c0_79 = arith.constant 0 : index
    %116 = vector.load %arg10[%c0_78, %c0_79] : memref<8x128xf32, #tpu.memory_space<vmem>>, vector<8x128xf32>
    %cst_80 = arith.constant dense<0.000000e+00> : vector<1x128xf32>
    %117 = tpu.matmul %113, %116, %cst_80 {dimension_numbers = #tpu.dot_dimension_numbers<[1], [0], [0], [1], [0, 0, 1, 1], [], []>} : vector<1x8xf32>, vector<8x128xf32>, vector<1x128xf32> -> vector<1x128xf32>
    %118 = vector.broadcast %115 : vector<1x128xf32> to vector<32x128xf32>
    %119 = arith.mulf %90, %118 : vector<32x128xf32>
    %120 = vector.broadcast %117 : vector<1x128xf32> to vector<32x128xf32>
    %121 = arith.addf %119, %120 : vector<32x128xf32>
    %c0_81 = arith.constant 0 : index
    %c0_82 = arith.constant 0 : index
    %122 = vector.load %arg11[%c0_81, %c0_82] : memref<32x128xf32, #tpu.memory_space<vmem>>, vector<32x128xf32>
    tpu.vector_store %arg11[%c0_81, %c0_82], %121 {strides = array<i32>} : memref<32x128xf32, #tpu.memory_space<vmem>>, vector<32x128xf32>,
    return
  }
}

</mosaic_0001>

<bundles_post_ra>
// kernel: tile.33
= control target key start
LH: loop header
LB: loop body
LE: loop exit
PB: predicated region body
PF: predicated region fallthrough
CT: control target
= control target key end

     0   :  { %vm6_vm0 = vcmask 1043458   ;;  %vm10_vm1 = vcmask 1045508   ;;  %vm14_vm2 = vcmask 1047558   ;;  %s19_s6 = smov 3  ;;  %s22_s7 = smov 12  ;;  %vm16_vm3 = vcmask 64512   ;;  %s736_s0 = inlined_call_operand.vmem [shape: f32[16,8,8], index: 0, kind: input, shape index: {}]   ;;  %s737_s1 = inlined_call_operand.vmem [shape: f32[128,8], index: 1, kind: output, shape index: {}]  }
   0x1   :  { %v348_v0 = vld [vmem:[%s736_s0 + $0xf] ss:$16 sm:%s19_s6]   ;;  %s27_s12 = smov 48  ;;  %s32_s13 = smov 192  ;;  %vm38_vm4 = vcmask 1048512   ;;  %vm60_vm5 = vcmask 982912  }
   0x2   :  { %v349_v1 = vld [vmem:[%s736_s0 + $0xf] ss:$16 sm:%s22_s7]   ;;  %s63_s18 = smov 3  ;;  %s66_s21 = smov 12  ;;  %vm82_vm6 = vcmask 917312   ;;  %vm104_vm7 = vcmask 851712  }
   0x3   :  { %v25_v2 = vsel %vm6_vm0, %v349_v1, %v348_v0  ;;  %v350_v3 = vld [vmem:[%s736_s0 + $0xf] ss:$16 sm:%s27_s12]   ;;  %v356_v6 = vld [vmem:[%s736_s0 + $0xd] ss:$16 sm:%s63_s18]   ;;  %s71_s22 = smov 48  ;;  %s76_s27 = smov 192 }
   0x4   :  { %v351_v4 = vld [vmem:[%s736_s0 + $0xf] ss:$16 sm:%s32_s13]   ;;  %v30_v5 = vsel %vm10_vm1, %v350_v3, %v25_v2  ;;  %v357_v8 = vld [vmem:[%s736_s0 + $0xd] ss:$16 sm:%s66_s21]   ;;  %s423_s28 = smov 120   ;;  %s41_s2 = smov 3 }
   0x5   :  { %v35_v7 = vsel %vm14_vm2, %v351_v4, %v30_v5  ;;  %v358_v9 = vld [vmem:[%s736_s0 + $0xd] ss:$16 sm:%s71_s22]   ;;  %v69_v10 = vsel %vm6_vm0, %v357_v8, %v356_v6  ;;  %s44_s3 = smov 12  ;;  %v352_v13 = vld [vmem:[%s736_s0 + $0xe] ss:$16 sm:%s41_s2]   ;;  %s49_s8 = smov 48 }
   0x6   :  { %36 = vrot.lane.b32.xlu0 %v35_v7, %s423_s28  ;;  %v359_v11 = vld [vmem:[%s736_s0 + $0xd] ss:$16 sm:%s76_s27]   ;;  %v74_v12 = vsel %vm10_vm1, %v358_v9, %v69_v10  ;;  %s54_s9 = smov 192  ;;  %s85_s14 = smov 3  ;;  %vm126_vm8 = vcmask 786112   ;;  %vm148_vm9 = vcmask 720512  }
   0x7   :  { %v353_v14 = vld [vmem:[%s736_s0 + $0xe] ss:$16 sm:%s44_s3]   ;;  %v79_v15 = vsel %vm14_vm2, %v359_v11, %v74_v12  ;;  %s424_s15 = smov 104   ;;  %v360_v20 = vld [vmem:[%s736_s0 + $0xc] ss:$16 sm:%s85_s14]   ;;  %s88_s18 = smov 12 }
   0x8   :  { %v47_v16 = vsel %vm6_vm0, %v353_v14, %v352_v13  ;;  %v354_v17 = vld [vmem:[%s736_s0 + $0xe] ss:$16 sm:%s49_s8]   ;;  %80 = vrot.lane.b32.xlu1 %v79_v15, %s424_s15  ;;  %s93_s19 = smov 48  ;;  %s98_s24 = smov 192  ;;  %vm170_vm10 = vcmask 654912   ;;  %vm192_vm11 = vcmask 589312  }
   0x9   :  { %v355_v18 = vld [vmem:[%s736_s0 + $0xe] ss:$16 sm:%s54_s9]   ;;  %v52_v19 = vsel %vm10_vm1, %v354_v17, %v47_v16  ;;  %v361_v22 = vld [vmem:[%s736_s0 + $0xc] ss:$16 sm:%s88_s18]   ;;  %s425_s25 = smov 112   ;;  %s107_s28 = smov 3 }
   0xa   :  { %v57_v21 = vsel %vm14_vm2, %v355_v18, %v52_v19  ;;  %v362_v23 = vld [vmem:[%s736_s0 + $0xc] ss:$16 sm:%s93_s19]   ;;  %v91_v24 = vsel %vm6_vm0, %v361_v22, %v360_v20  ;;  %s110_s29 = smov 12  ;;  %v364_v27 = vld [vmem:[%s736_s0 + $0xb] ss:$16 sm:%s107_s28]   ;;  %s115_s5 = smov 48 }
   0xb   :  { %58 = vrot.lane.b32.xlu0 %v57_v21, %s425_s25  ;;  %v363_v25 = vld [vmem:[%s736_s0 + $0xc] ss:$16 sm:%s98_s24]   ;;  %v96_v26 = vsel %vm10_vm1, %v362_v23, %v91_v24  ;;  %s120_s6 = smov 192  ;;  %s129_s11 = smov 3  ;;  %vm214_vm12 = vcmask 523712   ;;  %vm236_vm13 = vcmask 458112  }
   0xc   :  { %v365_v28 = vld [vmem:[%s736_s0 + $0xb] ss:$16 sm:%s110_s29]   ;;  %v101_v29 = vsel %vm14_vm2, %v363_v25, %v96_v26  ;;  %s426_s12 = smov 96   ;;  %v368_v34 = vld [vmem:[%s736_s0 + $0xa] ss:$16 sm:%s129_s11]   ;;  %s132_s15 = smov 12 }
   0xd   :  { %v113_v30 = vsel %vm6_vm0, %v365_v28, %v364_v27  ;;  %v366_v31 = vld [vmem:[%s736_s0 + $0xb] ss:$16 sm:%s115_s5]   ;;  %102 = vrot.lane.b32.xlu1 %v101_v29, %s426_s12  ;;  %s137_s16 = smov 48  ;;  %s142_s21 = smov 192  ;;  %vm258_vm14 = vcmask 392512   ;;  %vm280_vm15 = vcmask 326912  }
   0xe   :  { %v367_v32 = vld [vmem:[%s736_s0 + $0xb] ss:$16 sm:%s120_s6]   ;;  %v118_v33 = vsel %vm10_vm1, %v366_v31, %v113_v30  ;;  %v369_v36 = vld [vmem:[%s736_s0 + $0xa] ss:$16 sm:%s132_s15]   ;;  %s427_s22 = smov 88   ;;  %s151_s25 = smov 3 }
   0xf   :  { %v123_v35 = vsel %vm14_vm2, %v367_v32, %v118_v33  ;;  %v370_v37 = vld [vmem:[%s736_s0 + $0xa] ss:$16 sm:%s137_s16]   ;;  %v135_v38 = vsel %vm6_vm0, %v369_v36, %v368_v34  ;;  %s154_s26 = smov 12  ;;  %v372_v41 = vld [vmem:[%s736_s0 + $0x9] ss:$16 sm:%s151_s25]   ;;  %s159_s2 = smov 48 }
  0x10   :  { %124 = vrot.lane.b32.xlu0 %v123_v35, %s427_s22  ;;  %v371_v39 = vld [vmem:[%s736_s0 + $0xa] ss:$16 sm:%s142_s21]   ;;  %v140_v40 = vsel %vm10_vm1, %v370_v37, %v135_v38  ;;  %s164_s3 = smov 192  ;;  %s173_s8 = smov 3 }
  0x11   :  { %v373_v42 = vld [vmem:[%s736_s0 + $0x9] ss:$16 sm:%s154_s26]   ;;  %v145_v43 = vsel %vm14_vm2, %v371_v39, %v140_v40  ;;  %s428_s9 = smov 80   ;;  %v376_v48 = vld [vmem:[%s736_s0 + $0x8] ss:$16 sm:%s173_s8]   ;;  %s176_s12 = smov 12 }
  0x12   :  { %v157_v44 = vsel %vm6_vm0, %v373_v42, %v372_v41  ;;  %v374_v45 = vld [vmem:[%s736_s0 + $0x9] ss:$16 sm:%s159_s2]   ;;  %146 = vrot.lane.b32.xlu1 %v145_v43, %s428_s9  ;;  %s181_s13 = smov 48  ;;  %s186_s18 = smov 192 }
  0x13   :  { %v375_v46 = vld [vmem:[%s736_s0 + $0x9] ss:$16 sm:%s164_s3]   ;;  %v162_v47 = vsel %vm10_vm1, %v374_v45, %v157_v44  ;;  %v377_v50 = vld [vmem:[%s736_s0 + $0x8] ss:$16 sm:%s176_s12]   ;;  %s429_s19 = smov 72   ;;  %s195_s22 = smov 3 }
  0x14   :  { %v167_v49 = vsel %vm14_vm2, %v375_v46, %v162_v47  ;;  %v378_v51 = vld [vmem:[%s736_s0 + $0x8] ss:$16 sm:%s181_s13]   ;;  %v179_v52 = vsel %vm6_vm0, %v377_v50, %v376_v48  ;;  %s198_s23 = smov 12  ;;  %v380_v55 = vld [vmem:[%s736_s0 + $0x7] ss:$16 sm:%s195_s22]   ;;  %s203_s28 = smov 48 }
  0x15   :  { %168 = vrot.lane.b32.xlu0 %v167_v49, %s429_s19  ;;  %v379_v53 = vld [vmem:[%s736_s0 + $0x8] ss:$16 sm:%s186_s18]   ;;  %v184_v54 = vsel %vm10_vm1, %v378_v51, %v179_v52  ;;  %s208_s29 = smov 192  ;;  %s217_s5 = smov 3 }
  0x16   :  { %v381_v56 = vld [vmem:[%s736_s0 + $0x7] ss:$16 sm:%s198_s23]   ;;  %v189_v57 = vsel %vm14_vm2, %v379_v53, %v184_v54  ;;  %s430_s6 = smov 64   ;;  %v384_v62 = vld [vmem:[%s736_s0 + $0x6] ss:$16 sm:%s217_s5]   ;;  %s220_s9 = smov 12 }
  0x17   :  { %v201_v58 = vsel %vm6_vm0, %v381_v56, %v380_v55  ;;  %v382_v59 = vld [vmem:[%s736_s0 + $0x7] ss:$16 sm:%s203_s28]   ;;  %190 = vrot.lane.b32.xlu1 %v189_v57, %s430_s6  ;;  %s225_s10 = smov 48  ;;  %s230_s15 = smov 192 }
  0x18   :  { %v383_v60 = vld [vmem:[%s736_s0 + $0x7] ss:$16 sm:%s208_s29]   ;;  %v206_v61 = vsel %vm10_vm1, %v382_v59, %v201_v58  ;;  %v385_v0 = vld [vmem:[%s736_s0 + $0x6] ss:$16 sm:%s220_s9]   ;;  %s431_s16 = smov 56   ;;  %s239_s19 = smov 3 }
  0x19   :  { %v211_v63 = vsel %vm14_vm2, %v383_v60, %v206_v61  ;;  %v386_v1 = vld [vmem:[%s736_s0 + $0x6] ss:$16 sm:%s225_s10]   ;;  %v223_v2 = vsel %vm6_vm0, %v385_v0, %v384_v62  ;;  %s242_s20 = smov 12  ;;  %v388_v5 = vld [vmem:[%s736_s0 + $0x5] ss:$16 sm:%s239_s19]   ;;  %s247_s25 = smov 48 }
  0x1a   :  { %212 = vrot.lane.b32.xlu0 %v211_v63, %s431_s16  ;;  %v387_v3 = vld [vmem:[%s736_s0 + $0x6] ss:$16 sm:%s230_s15]   ;;  %v228_v4 = vsel %vm10_vm1, %v386_v1, %v223_v2  ;;  %s252_s26 = smov 192  ;;  %s261_s2 = smov 3 }
  0x1b   :  { %v389_v6 = vld [vmem:[%s736_s0 + $0x5] ss:$16 sm:%s242_s20]   ;;  %v233_v7 = vsel %vm14_vm2, %v387_v3, %v228_v4  ;;  %s432_s3 = smov 48   ;;  %v392_v12 = vld [vmem:[%s736_s0 + $0x4] ss:$16 sm:%s261_s2]   ;;  %s264_s6 = smov 12 }
  0x1c   :  { %v245_v8 = vsel %vm6_vm0, %v389_v6, %v388_v5  ;;  %v390_v9 = vld [vmem:[%s736_s0 + $0x5] ss:$16 sm:%s247_s25]   ;;  %234 = vrot.lane.b32.xlu1 %v233_v7, %s432_s3  ;;  %s269_s7 = smov 48  ;;  %s274_s12 = smov 192 }
  0x1d   :  { %v391_v10 = vld [vmem:[%s736_s0 + $0x5] ss:$16 sm:%s252_s26]   ;;  %v250_v11 = vsel %vm10_vm1, %v390_v9, %v245_v8  ;;  %v393_v14 = vld [vmem:[%s736_s0 + $0x4] ss:$16 sm:%s264_s6]   ;;  %s433_s13 = smov 40   ;;  %s283_s16 = smov 3 }
  0x1e   :  { %v255_v13 = vsel %vm14_vm2, %v391_v10, %v250_v11  ;;  %v394_v15 = vld [vmem:[%s736_s0 + $0x4] ss:$16 sm:%s269_s7]   ;;  %v267_v16 = vsel %vm6_vm0, %v393_v14, %v392_v12  ;;  %s286_s17 = smov 12  ;;  %v396_v19 = vld [vmem:[%s736_s0 + $0x3] ss:$16 sm:%s283_s16]   ;;  %s291_s22 = smov 48 }
  0x1f   :  { %256 = vrot.lane.b32.xlu0 %v255_v13, %s433_s13  ;;  %v395_v17 = vld [vmem:[%s736_s0 + $0x4] ss:$16 sm:%s274_s12]   ;;  %v272_v18 = vsel %vm10_vm1, %v394_v15, %v267_v16  ;;  %s296_s23 = smov 192  ;;  %s305_s28 = smov 3 }
  0x20   :  { %v397_v20 = vld [vmem:[%s736_s0 + $0x3] ss:$16 sm:%s286_s17]   ;;  %v277_v21 = vsel %vm14_vm2, %v395_v17, %v272_v18  ;;  %s434_s29 = smov 32   ;;  %v400_v26 = vld [vmem:[%s736_s0 + $0x2] ss:$16 sm:%s305_s28]   ;;  %s308_s3 = smov 12 }
  0x21   :  { %v289_v22 = vsel %vm6_vm0, %v397_v20, %v396_v19  ;;  %v398_v23 = vld [vmem:[%s736_s0 + $0x3] ss:$16 sm:%s291_s22]   ;;  %278 = vrot.lane.b32.xlu1 %v277_v21, %s434_s29  ;;  %s313_s4 = smov 48  ;;  %s318_s9 = smov 192 }
  0x22   :  { %v399_v24 = vld [vmem:[%s736_s0 + $0x3] ss:$16 sm:%s296_s23]   ;;  %v294_v25 = vsel %vm10_vm1, %v398_v23, %v289_v22  ;;  %v401_v28 = vld [vmem:[%s736_s0 + $0x2] ss:$16 sm:%s308_s3]   ;;  %s435_s10 = smov 24   ;;  %s327_s13 = smov 3 }
  0x23   :  { %v299_v27 = vsel %vm14_vm2, %v399_v24, %v294_v25  ;;  %v402_v29 = vld [vmem:[%s736_s0 + $0x2] ss:$16 sm:%s313_s4]   ;;  %v311_v30 = vsel %vm6_vm0, %v401_v28, %v400_v26  ;;  %s330_s14 = smov 12  ;;  %v404_v33 = vld [vmem:[%s736_s0 + $0x1] ss:$16 sm:%s327_s13]   ;;  %s335_s19 = smov 48 }
  0x24   :  { %300 = vrot.lane.b32.xlu0 %v299_v27, %s435_s10  ;;  %v403_v31 = vld [vmem:[%s736_s0 + $0x2] ss:$16 sm:%s318_s9]   ;;  %v316_v32 = vsel %vm10_vm1, %v402_v29, %v311_v30  ;;  %s340_s20 = smov 192  ;;  %s2_s25 = smov 3 }
  0x25   :  { %v405_v34 = vld [vmem:[%s736_s0 + $0x1] ss:$16 sm:%s330_s14]   ;;  %v321_v35 = vsel %vm14_vm2, %v403_v31, %v316_v32  ;;  %s436_s26 = smov 16   ;;  %s4_s27 = smov 12  ;;  %v3_v40 = vld [vmem:[%s736_s0] ss:$16 sm:%s2_s25]  }
  0x26   :  { %v333_v36 = vsel %vm6_vm0, %v405_v34, %v404_v33  ;;  %v406_v37 = vld [vmem:[%s736_s0 + $0x1] ss:$16 sm:%s335_s19]   ;;  %322 = vrot.lane.b32.xlu1 %v321_v35, %s436_s26  ;;  %s8_s28 = smov 48  ;;  %s12_s2 = smov 192 }
  0x27   :  { %v407_v38 = vld [vmem:[%s736_s0 + $0x1] ss:$16 sm:%s340_s20]   ;;  %v338_v39 = vsel %vm10_vm1, %v406_v37, %v333_v36  ;;  %v5_v42 = vld [vmem:[%s736_s0] ss:$16 sm:%s4_s27]   ;;  %s437_s7 = smov 8  }
  0x28   :  { %v343_v41 = vsel %vm14_vm2, %v407_v38, %v338_v39  ;;  %v9_v43 = vld [vmem:[%s736_s0] ss:$16 sm:%s8_s28]   ;;  %v7_v44 = vsel %vm6_vm0, %v5_v42, %v3_v40  ;;  %vm302_vm0 = vcmask 261312  }
  0x29   :  { %344 = vrot.lane.b32.xlu0 %v343_v41, %s437_s7  ;;  %v13_v45 = vld [vmem:[%s736_s0] ss:$16 sm:%s12_s2]   ;;  %v11_v46 = vsel %vm10_vm1, %v9_v43, %v7_v44  ;;  %vm324_vm1 = vcmask 195712  }
  0x2a   :  { %v15_v47 = vsel %vm14_vm2, %v13_v45, %v11_v46  ;;  %vm346_vm2 = vcmask 130112  }
  0x2b   :  { %17 = vst.msk [vmem:[%s737_s1] sm:$0xff] %vm16_vm3, %v15_v47  }
  0x78   :  { %v37_v48 = vpop.permute.xlu0 %36  }
  0x79   :  { %39 = vst.msk [vmem:[%s737_s1] sm:$0xff] %vm38_vm4, %v37_v48  }
  0x7a   :  { %v81_v49 = vpop.permute.xlu1 %80  }
  0x7d   :  { %v59_v50 = vpop.permute.xlu0 %58  }
  0x7e   :  { %61 = vst.msk [vmem:[%s737_s1] sm:$0xff] %vm60_vm5, %v59_v50  }
  0x7f   :  { %83 = vst.msk [vmem:[%s737_s1] sm:$0xff] %vm82_vm6, %v81_v49   ;;  %v103_v51 = vpop.permute.xlu1 %102  }
  0x80   :  { %105 = vst.msk [vmem:[%s737_s1] sm:$0xff] %vm104_vm7, %v103_v51  }
  0x82   :  { %v125_v52 = vpop.permute.xlu0 %124  }
  0x83   :  { %127 = vst.msk [vmem:[%s737_s1] sm:$0xff] %vm126_vm8, %v125_v52  }
  0x84   :  { %v147_v53 = vpop.permute.xlu1 %146  }
  0x85   :  { %149 = vst.msk [vmem:[%s737_s1] sm:$0xff] %vm148_vm9, %v147_v53  }
  0x87   :  { %v169_v54 = vpop.permute.xlu0 %168  }
  0x88   :  { %171 = vst.msk [vmem:[%s737_s1] sm:$0xff] %vm170_vm10, %v169_v54  }
  0x89   :  { %v191_v55 = vpop.permute.xlu1 %190  }
  0x8a   :  { %193 = vst.msk [vmem:[%s737_s1] sm:$0xff] %vm192_vm11, %v191_v55  }
  0x8c   :  { %v213_v56 = vpop.permute.xlu0 %212  }
  0x8d   :  { %215 = vst.msk [vmem:[%s737_s1] sm:$0xff] %vm214_vm12, %v213_v56  }
  0x8e   :  { %v235_v57 = vpop.permute.xlu1 %234  }
  0x8f   :  { %237 = vst.msk [vmem:[%s737_s1] sm:$0xff] %vm236_vm13, %v235_v57  }
  0x91   :  { %v257_v58 = vpop.permute.xlu0 %256  }
  0x92   :  { %259 = vst.msk [vmem:[%s737_s1] sm:$0xff] %vm258_vm14, %v257_v58  }
  0x93   :  { %v279_v59 = vpop.permute.xlu1 %278  }
  0x94   :  { %281 = vst.msk [vmem:[%s737_s1] sm:$0xff] %vm280_vm15, %v279_v59  }
  0x96   :  { %v301_v60 = vpop.permute.xlu0 %300  }
  0x97   :  { %303 = vst.msk [vmem:[%s737_s1] sm:$0xff] %vm302_vm0, %v301_v60  }
  0x98   :  { %v323_v61 = vpop.permute.xlu1 %322  }
  0x99   :  { %325 = vst.msk [vmem:[%s737_s1] sm:$0xff] %vm324_vm1, %v323_v61  }
  0x9b   :  { %v345_v62 = vpop.permute.xlu0 %344  }
  0x9c   :  { %347 = vst.msk [vmem:[%s737_s1] sm:$0xff] %vm346_vm2, %v345_v62  }

// kernel: tile.20
= control target key start
LH: loop header
LB: loop body
LE: loop exit
PB: predicated region body
PF: predicated region fallthrough
CT: control target
= control target key end

     0   :  { %s7_s6 = smov 3  ;;  %s21_s9 = smov 3  ;;  %vm4_vm0 = vcmask 64512   ;;  %vm11_vm1 = vcmask 1048512   ;;  %vm18_vm2 = vcmask 982912   ;;  %vm25_vm3 = vcmask 917312   ;;  %s225_s0 = inlined_call_operand.vmem [shape: f32[2,16,8], index: 0, kind: input, shape index: {}]   ;;  %s226_s1 = inlined_call_operand.vmem [shape: f32[2,128], index: 1, kind: output, shape index: {}]  }
   0x1   :  { %v119_v0 = vld [vmem:[%s225_s0 + $0xf] ss:$16 sm:%s7_s6]   ;;  %s149_s10 = smov 120   ;;  %v121_v1 = vld [vmem:[%s225_s0 + $0xd] ss:$16 sm:%s21_s9]   ;;  %s14_s13 = smov 3 }
   0x2   :  { %9 = vrot.lane.b32.xlu0 %v119_v0, %s149_s10  ;;  %s150_s14 = smov 104   ;;  %v120_v2 = vld [vmem:[%s225_s0 + $0xe] ss:$16 sm:%s14_s13]   ;;  %s28_s17 = smov 3  ;;  %vm32_vm4 = vcmask 851712   ;;  %vm39_vm5 = vcmask 786112  }
   0x3   :  { %23 = vrot.lane.b32.xlu1 %v121_v1, %s150_s14  ;;  %v122_v3 = vld [vmem:[%s225_s0 + $0xc] ss:$16 sm:%s28_s17]   ;;  %s35_s20 = smov 3  ;;  %s42_s21 = smov 3  ;;  %vm46_vm6 = vcmask 720512   ;;  %vm53_vm7 = vcmask 654912  }
   0x4   :  { %s151_s22 = smov 112   ;;  %s152_s23 = smov 96   ;;  %v123_v4 = vld [vmem:[%s225_s0 + $0xb] ss:$16 sm:%s35_s20]   ;;  %v124_v5 = vld [vmem:[%s225_s0 + $0xa] ss:$16 sm:%s42_s21]  }
   0x5   :  { %s49_s28 = smov 3  ;;  %s56_s29 = smov 3  ;;  %vm60_vm8 = vcmask 589312   ;;  %vm67_vm9 = vcmask 523712   ;;  %vm74_vm10 = vcmask 458112   ;;  %vm81_vm11 = vcmask 392512  }
   0x6   :  { %16 = vrot.lane.b32.xlu0 %v120_v2, %s151_s22  ;;  %s153_s30 = smov 88   ;;  %s154_s2 = smov 80   ;;  %v125_v6 = vld [vmem:[%s225_s0 + $0x9] ss:$16 sm:%s49_s28]   ;;  %vm88_vm12 = vcmask 326912   ;;  %vm95_vm13 = vcmask 261312  }
   0x7   :  { %30 = vrot.lane.b32.xlu1 %v122_v3, %s152_s23  ;;  %v126_v7 = vld [vmem:[%s225_s0 + $0x8] ss:$16 sm:%s56_s29]   ;;  %s63_s7 = smov 3  ;;  %s70_s8 = smov 3  ;;  %vm102_vm14 = vcmask 195712   ;;  %vm109_vm15 = vcmask 130112  }
   0x8   :  { %s155_s9 = smov 72   ;;  %s156_s10 = smov 64   ;;  %v127_v8 = vld [vmem:[%s225_s0 + $0x7] ss:$16 sm:%s63_s7]   ;;  %v128_v9 = vld [vmem:[%s225_s0 + $0x6] ss:$16 sm:%s70_s8]  }
   0x9   :  { %s2_s13 = smov 3  ;;  %s77_s16 = smov 3 }
   0xa   :  { %37 = vrot.lane.b32.xlu0 %v123_v4, %s153_s30  ;;  %v3_v10 = vld [vmem:[%s225_s0] ss:$16 sm:%s2_s13]   ;;  %s84_s19 = smov 3  ;;  %s157_s20 = smov 56  }
   0xb   :  { %44 = vrot.lane.b32.xlu1 %v124_v5, %s154_s2  ;;  %5 = vst.msk [vmem:[#allocation0] sm:$0x3] %vm4_vm0, %v3_v10   ;;  %s158_s21 = smov 48   ;;  %v129_v11 = vld [vmem:[%s225_s0 + $0x5] ss:$16 sm:%s77_s16]   ;;  %s91_s26 = smov 3 }
   0xc   :  { %v130_v12 = vld [vmem:[%s225_s0 + $0x4] ss:$16 sm:%s84_s19]   ;;  %s98_s27 = smov 3  ;;  %s159_s28 = smov 40   ;;  %v131_v13 = vld [vmem:[%s225_s0 + $0x3] ss:$16 sm:%s91_s26]  }
   0xd   :  { %s160_s29 = smov 32   ;;  %v132_v14 = vld [vmem:[%s225_s0 + $0x2] ss:$16 sm:%s98_s27]   ;;  %s105_s5 = smov 3 }
   0xe   :  { %51 = vrot.lane.b32.xlu0 %v125_v6, %s155_s9  ;;  %s161_s6 = smov 24   ;;  %s162_s7 = smov 16   ;;  %v133_v15 = vld [vmem:[%s225_s0 + $0x1] ss:$16 sm:%s105_s5]  }
   0xf   :  { %58 = vrot.lane.b32.xlu1 %v126_v7, %s156_s10  ;;  %s163_s0 = smov 8  }
  0x12   :  { %65 = vrot.lane.b32.xlu0 %v127_v8, %s157_s20 }
  0x13   :  { %72 = vrot.lane.b32.xlu1 %v128_v9, %s158_s21 }
  0x16   :  { %79 = vrot.lane.b32.xlu0 %v129_v11, %s159_s28 }
  0x17   :  { %86 = vrot.lane.b32.xlu1 %v130_v12, %s160_s29 }
  0x1a   :  { %93 = vrot.lane.b32.xlu0 %v131_v13, %s161_s6 }
  0x1b   :  { %100 = vrot.lane.b32.xlu1 %v132_v14, %s162_s7 }
  0x1e   :  { %107 = vrot.lane.b32.xlu0 %v133_v15, %s163_s0 }
  0x74   :  { %v10_v16 = vpop.permute.xlu0 %9  }
  0x75   :  { %12 = vst.msk [vmem:[#allocation0] sm:$0x3] %vm11_vm1, %v10_v16   ;;  %v24_v17 = vpop.permute.xlu1 %23  }
  0x78   :  { %v17_v18 = vpop.permute.xlu0 %16  }
  0x79   :  { %19 = vst.msk [vmem:[#allocation0] sm:$0x3] %vm18_vm2, %v17_v18   ;;  %v31_v19 = vpop.permute.xlu1 %30  }
  0x7a   :  { %26 = vst.msk [vmem:[#allocation0] sm:$0x3] %vm25_vm3, %v24_v17  }
  0x7b   :  { %33 = vst.msk [vmem:[#allocation0] sm:$0x3] %vm32_vm4, %v31_v19  }
  0x7c   :  { %v38_v20 = vpop.permute.xlu0 %37  }
  0x7d   :  { %40 = vst.msk [vmem:[#allocation0] sm:$0x3] %vm39_vm5, %v38_v20   ;;  %v45_v21 = vpop.permute.xlu1 %44  }
  0x7e   :  { %47 = vst.msk [vmem:[#allocation0] sm:$0x3] %vm46_vm6, %v45_v21  }
  0x80   :  { %v52_v22 = vpop.permute.xlu0 %51  }
  0x81   :  { %54 = vst.msk [vmem:[#allocation0] sm:$0x3] %vm53_vm7, %v52_v22   ;;  %v59_v23 = vpop.permute.xlu1 %58  }
  0x82   :  { %61 = vst.msk [vmem:[#allocation0] sm:$0x3] %vm60_vm8, %v59_v23  }
  0x84   :  { %v66_v24 = vpop.permute.xlu0 %65  }
  0x85   :  { %68 = vst.msk [vmem:[#allocation0] sm:$0x3] %vm67_vm9, %v66_v24   ;;  %v73_v25 = vpop.permute.xlu1 %72  }
  0x86   :  { %75 = vst.msk [vmem:[#allocation0] sm:$0x3] %vm74_vm10, %v73_v25  }
  0x88   :  { %v80_v26 = vpop.permute.xlu0 %79  }
  0x89   :  { %82 = vst.msk [vmem:[#allocation0] sm:$0x3] %vm81_vm11, %v80_v26   ;;  %v87_v27 = vpop.permute.xlu1 %86  }
  0x8a   :  { %89 = vst.msk [vmem:[#allocation0] sm:$0x3] %vm88_vm12, %v87_v27  }
  0x8c   :  { %v94_v28 = vpop.permute.xlu0 %93  }
  0x8d   :  { %96 = vst.msk [vmem:[#allocation0] sm:$0x3] %vm95_vm13, %v94_v28   ;;  %v101_v29 = vpop.permute.xlu1 %100  }
  0x8e   :  { %103 = vst.msk [vmem:[#allocation0] sm:$0x3] %vm102_vm14, %v101_v29  }
  0x90   :  { %v108_v30 = vpop.permute.xlu0 %107  }
  0x91   :  { %110 = vst.msk [vmem:[#allocation0] sm:$0x3] %vm109_vm15, %v108_v30  }
  0x98   :  { %v115_v31 = vld [vmem:[#allocation0] sm:$0x3] }
  0x99   :  { %118 = vst [vmem:[%s226_s1] sm:$0x3] %v115_v31 }

// kernel: in_res_block.1
= control target key start
LH: loop header
LB: loop body
LE: loop exit
PB: predicated region body
PF: predicated region fallthrough
CT: control target
= control target key end

     0   :  { %v40_v0 = vlaneseq  ;;  %vm154_vm1 = vcmask 523264   ;;  %vm488_vm4 = vcmask 1041408   ;;  %vm475_vm6 = vcmask 15360   ;;  %s2364_s3 = inlined_call_operand.vmem [shape: f32[3,64,128], index: 3, kind: input, shape index: {}]   ;;  %s2365_s0 = inlined_call_operand.vmem [shape: f32[34,64], index: 0, kind: input, shape index: {}]   ;;  %s2366_s1 = inlined_call_operand.vmem [shape: f32[2,128], index: 1, kind: input, shape index: {}]   ;;  %s2367_s2 = inlined_call_operand.vmem [shape: f32[32,2], index: 2, kind: input, shape index: {}]   ;;  %s2368_s5 = inlined_call_operand.vmem [shape: f32[3,128,128], index: 5, kind: input, shape index: {}]   ;;  %s2369_s4 = inlined_call_operand.vmem [shape: f32[1,128], index: 4, kind: input, shape index: {}]   ;;  %s2370_s12 = inlined_call_operand.vmem [shape: f32[32,128], index: 12, kind: output, shape index: {1}]   ;;  %s2371_s9 = inlined_call_operand.vmem [shape: f32[128,8], index: 9, kind: input, shape index: {}]   ;;  %s2372_s6 = inlined_call_operand.vmem [shape: f32[1,128], index: 6, kind: input, shape index: {}]   ;;  %s2373_s10 = inlined_call_operand.vmem [shape: f32[8,128], index: 10, kind: input, shape index: {}]   ;;  %s2374_s7 = inlined_call_operand.vmem [shape: f32[1,8], index: 7, kind: input, shape index: {}]   ;;  %s2375_s8 = inlined_call_operand.vmem [shape: f32[1,8], index: 8, kind: input, shape index: {}]   ;;  %s2376_s11 = inlined_call_operand.vmem [shape: f32[32,128], index: 11, kind: output, shape index: {0}]  }
   0x1   :  { %v1327_v1 = vld [vmem:[%s2364_s3 + $0x78] sm:$0xff]  ;;  %v1326_v3 = vld [vmem:[%s2364_s3 + $0x70] sm:$0xff]  ;;  %v1325_v5 = vld [vmem:[%s2364_s3 + $0x68] sm:$0xff]  ;;  %vm1805_vm11 = vmmov 0  }
   0x2   :  { %v144_v2 = vld [vmem:[%s2364_s3 + $0x38] sm:$0xff]  ;;  %1532 = vmatprep.subr.mxu0 %v1327_v1  ;;  %v143_v4 = vld [vmem:[%s2364_s3 + $0x30] sm:$0xff]  ;;  %v142_v6 = vld [vmem:[%s2364_s3 + $0x28] sm:$0xff]  ;;  %v1889_v7 = vshrl.u32 %v40_v0, 7 }
   0x3   :  { %1554 = vmatprep.subr.mxu1 %v144_v2  ;;  %1533 = vmatpush3.msra.mxu0 %v1327_v1  ;;  %v1324_v8 = vld [vmem:[%s2364_s3 + $0x60] sm:$0xff]  ;;  %v1323_v10 = vld [vmem:[%s2364_s3 + $0x58] sm:$0xff]  ;;  %v1322_v14 = vld [vmem:[%s2364_s3 + $0x50] sm:$0xff] }
   0x4   :  { %1555 = vmatpush3.msra.mxu1 %v144_v2  ;;  %1534 = vmatprep.subr.mxu0 %v1326_v3  ;;  %v141_v9 = vld [vmem:[%s2364_s3 + $0x20] sm:$0xff]  ;;  %v140_v11 = vld [vmem:[%s2364_s3 + $0x18] sm:$0xff]  ;;  %v43_v12 = vadd.s32 16, %v1889_v7  ;;  %v49_v13 = vand.u32 15, %v1889_v7  ;;  %v139_v15 = vld [vmem:[%s2364_s3 + $0x10] sm:$0xff]  ;;  %v42_v37 = vadd.s32 8, %v1889_v7 }
   0x5   :  { %1556 = vmatprep.subr.mxu1 %v143_v4  ;;  %1535 = vmatpush3.msra.mxu0 %v1326_v3  ;;  %v1321_v16 = vld [vmem:[%s2364_s3 + $0x48] sm:$0xff]  ;;  %v105_v20 = vld [vmem:[%s2365_s0] sm:$0xff]  ;;  %v107_v26 = vld [vmem:[%s2365_s0 + $0x10] sm:$0xff]  ;;  %v44_v41 = vadd.s32 24, %v1889_v7 }
   0x6   :  { %1557 = vmatpush3.msra.mxu1 %v143_v4  ;;  %1536 = vmatprep.subr.mxu0 %v1325_v5  ;;  %v138_v17 = vld [vmem:[%s2364_s3 + $0x8] sm:$0xff]  ;;  %v63_v18 = vand.u32 15, %v43_v12  ;;  %vm1917_vm0 = vcmp.ne.s32.totalorder %v49_v13, 0  ;;  %v1320_v21 = vld [vmem:[%s2364_s3 + $0x40] sm:$0xff]  ;;  %v1343_v29 = vld [vmem:[%s2364_s3 + $0xb8] sm:$0xff]  ;;  %v56_v40 = vand.u32 15, %v42_v37 }
   0x7   :  { %1558 = vmatprep.subr.mxu1 %v142_v6  ;;  %1537 = vmatpush3.msra.mxu0 %v1325_v5  ;;  %v137_v22 = vld [vmem:[%s2364_s3] sm:$0xff]  ;;  %v117_v24 = vsel %vm1917_vm0, %v105_v20, 0.0  ;;  %v102_v27 = vld [vmem:[%s2365_s0 + $0x9] sm:$0xff]  ;;  %v103_v30 = vld [vmem:[%s2365_s0 + $0x11] sm:$0xff]  ;;  %v70_v46 = vand.u32 15, %v44_v41 }
   0x8   :  { %1559 = vmatpush3.msra.mxu1 %v142_v6  ;;  %1538 = vmatprep.subr.mxu0 %v1324_v8  ;;  %v101_v23 = vld [vmem:[%s2365_s0 + $0x1] sm:$0xff]  ;;  %vm1935_vm2 = vcmp.ne.s32.totalorder %v63_v18, 0  ;;  %v1342_v32 = vld [vmem:[%s2364_s3 + $0xb0] sm:$0xff]  ;;  %v108_v33 = vld [vmem:[%s2365_s0 + $0x18] sm:$0xff]  ;;  %vm1994_vm3 = vcmp.ne.s32.totalorder %v56_v40, 15 }
   0x9   :  { %1560 = vmatprep.subr.mxu1 %v141_v9  ;;  %1539 = vmatpush3.msra.mxu0 %v1324_v8  ;;  %v106_v28 = vld [vmem:[%s2365_s0 + $0x8] sm:$0xff]  ;;  %v119_v31 = vsel %vm1935_vm2, %v107_v26, 0.0  ;;  %v104_v35 = vld [vmem:[%s2365_s0 + $0x19] sm:$0xff]  ;;  %v1338_v42 = vld [vmem:[%s2364_s3 + $0x90] sm:$0xff]  ;;  %vm2012_vm5 = vcmp.ne.s32.totalorder %v70_v46, 15 }
   0xa   :  { %1561 = vmatpush3.msra.mxu1 %v141_v9  ;;  %1540 = vmatprep.subr.mxu0 %v1323_v10  ;;  %v1341_v34 = vld [vmem:[%s2364_s3 + $0xa8] sm:$0xff]  ;;  %v1340_v38 = vld [vmem:[%s2364_s3 + $0xa0] sm:$0xff]  ;;  %v1339_v39 = vld [vmem:[%s2364_s3 + $0x98] sm:$0xff] }
   0xb   :  { %1562 = vmatprep.subr.mxu1 %v140_v11  ;;  %1541 = vmatpush3.msra.mxu0 %v1323_v10  ;;  %v121_v36 = vld [vmem:[%s2365_s0 + $0x2] sm:$0xff]  ;;  %v122_v45 = vld [vmem:[%s2365_s0 + $0xa] sm:$0xff]  ;;  %v474_v49 = vld [vmem:[%s2366_s1] sm:$0x3] }
   0xc   :  { %1563 = vmatpush3.msra.mxu1 %v140_v11  ;;  %1542 = vmatprep.subr.mxu0 %v1322_v14  ;;  %v1337_v43 = vld [vmem:[%s2364_s3 + $0x88] sm:$0xff]  ;;  %v1336_v47 = vld [vmem:[%s2364_s3 + $0x80] sm:$0xff]  ;;  %v134_v48 = vsel %vm1994_vm3, %v122_v45, 0.0  ;;  %v123_v50 = vld [vmem:[%s2365_s0 + $0x12] sm:$0xff] }
   0xd   :  { %1564 = vmatprep.subr.mxu1 %v139_v15  ;;  %1543 = vmatpush3.msra.mxu0 %v1322_v14  ;;  %v124_v52 = vld [vmem:[%s2365_s0 + $0x1a] sm:$0xff]  ;;  %v471_v55 = vld [vmem:[%s2367_s2 + $0x8] sm:$0xff]  ;;  %v472_v56 = vld [vmem:[%s2367_s2 + $0x10] sm:$0xff] }
   0xe   :  { %1565 = vmatpush3.msra.mxu1 %v139_v15  ;;  %1544 = vmatprep.subr.mxu0 %v1321_v16  ;;  %v136_v53 = vsel %vm2012_vm5, %v124_v52, 0.0  ;;  %v470_v54 = vld [vmem:[%s2367_s2] sm:$0xff]  ;;  %v473_v57 = vld [vmem:[%s2367_s2 + $0x18] sm:$0xff]  ;;  %v1368_v59 = vld [vmem:[%s2368_s5 + $0xf0] sm:$0xff] }
   0xf   :  { %1566 = vmatprep.subr.mxu1 %v138_v17  ;;  %1545 = vmatpush3.msra.mxu0 %v1321_v16  ;;  %v1369_v58 = vld [vmem:[%s2368_s5 + $0xf8] sm:$0xff]  ;;  %v1367_v60 = vld [vmem:[%s2368_s5 + $0xe8] sm:$0xff]  ;;  %v1366_v61 = vld [vmem:[%s2368_s5 + $0xe0] sm:$0xff] }
  0x10   :  { %1567 = vmatpush3.msra.mxu1 %v138_v17  ;;  %1546 = vmatprep.subr.mxu0 %v1320_v21  ;;  %v634_v62 = vld [vmem:[%s2368_s5 + $0x78] sm:$0xff]  ;;  %v633_v0 = vld [vmem:[%s2368_s5 + $0x70] sm:$0xff]  ;;  %v632_v2 = vld [vmem:[%s2368_s5 + $0x68] sm:$0xff] }
  0x11   :  { %1568 = vmatprep.subr.mxu1 %v137_v22  ;;  %1547 = vmatpush3.msra.mxu0 %v1320_v21  ;;  %v1365_v63 = vld [vmem:[%s2368_s5 + $0xd8] sm:$0xff]  ;;  %v1364_v1 = vld [vmem:[%s2368_s5 + $0xd0] sm:$0xff]  ;;  %v631_v3 = vld [vmem:[%s2368_s5 + $0x60] sm:$0xff] }
  0x12   :  { %1548 = vmatprep.mubr.msk.f32.mxu0 %vm154_vm1, %v101_v23  ;;  %1569 = vmatpush3.msra.mxu1 %v137_v22  ;;  %v1363_v4 = vld [vmem:[%s2368_s5 + $0xc8] sm:$0xff]  ;;  %v1362_v5 = vld [vmem:[%s2368_s5 + $0xc0] sm:$0xff]  ;;  %v1361_v6 = vld [vmem:[%s2368_s5 + $0xb8] sm:$0xff] }
  0x13   :  { %1570 = vmatprep.mubr.msk.f32.mxu1 %vm154_vm1, %v117_v24  ;;  %1549 = vmatmul.mubr.msk.f32.vlgmr.msra.gmra.mxu0 %vm154_vm1, %v102_v27  ;;  %v630_v8 = vld [vmem:[%s2368_s5 + $0x58] sm:$0xff]  ;;  %v1360_v9 = vld [vmem:[%s2368_s5 + $0xb0] sm:$0xff]  ;;  %v1359_v11 = vld [vmem:[%s2368_s5 + $0xa8] sm:$0xff]  ;;  %v1804_v27 = vmov 0.0  }
  0x14   :  { %1571 = vmatmul.mubr.msk.f32.vlgmr.msra.gmra.mxu1 %vm154_vm1, %v106_v28  ;;  %1576 = vmatprep.subr.mxu0 %v1343_v29  ;;  %v629_v10 = vld [vmem:[%s2368_s5 + $0x50] sm:$0xff]  ;;  %v628_v12 = vld [vmem:[%s2368_s5 + $0x48] sm:$0xff]  ;;  %v1358_v13 = vld [vmem:[%s2368_s5 + $0xa0] sm:$0xff]  ;;  %597 = vst [vmem:[#allocation2] sm:$0x1] %v1804_v27 }
  0x15   :  { %1551 = vmatprep.mubr.msk.f32.mxu0 %vm154_vm1, %v103_v30  ;;  %1577 = vmatpush3.msra.mxu0 %v1343_v29  ;;  %v627_v14 = vld [vmem:[%s2368_s5 + $0x40] sm:$0xff]  ;;  %v1357_v15 = vld [vmem:[%s2368_s5 + $0x98] sm:$0xff]  ;;  %v1356_v17 = vld [vmem:[%s2368_s5 + $0x90] sm:$0xff]  ;;  %598 = vst [vmem:[#allocation2 + $0x21] sm:$0x1] %v1804_v27 }
  0x16   :  { %1573 = vmatprep.mubr.msk.f32.mxu1 %vm154_vm1, %v119_v31  ;;  %1578 = vmatprep.subr.mxu0 %v1342_v32  ;;  %v626_v16 = vld [vmem:[%s2368_s5 + $0x38] sm:$0xff]  ;;  %v625_v18 = vld [vmem:[%s2368_s5 + $0x30] sm:$0xff]  ;;  %v1355_v20 = vld [vmem:[%s2368_s5 + $0x88] sm:$0xff] }
  0x17   :  { %1579 = vmatpush3.msra.mxu0 %v1342_v32  ;;  %1606 = vmatprep.subr.mxu1 %v1369_v58  ;;  %v624_v21 = vld [vmem:[%s2368_s5 + $0x28] sm:$0xff]  ;;  %v1354_v22 = vld [vmem:[%s2368_s5 + $0x80] sm:$0xff]  ;;  %v2123_v24 = vld [vmem:[%s2368_s5 + $0x178] sm:$0xff] }
  0x18   :  { %1574 = vmatmul.mubr.msk.f32.gmra.mxu1 %vm154_vm1, %v108_v33  ;;  %1580 = vmatprep.subr.mxu0 %v1341_v34  ;;  %v623_v23 = vld [vmem:[%s2368_s5 + $0x20] sm:$0xff]  ;;  %v622_v26 = vld [vmem:[%s2368_s5 + $0x18] sm:$0xff]  ;;  %v621_v28 = vld [vmem:[%s2368_s5 + $0x10] sm:$0xff] }
  0x19   :  { %1552 = vmatmul.mubr.msk.f32.gmra.mxu0 %vm154_vm1, %v104_v35  ;;  %1607 = vmatpush3.msra.mxu1 %v1369_v58  ;;  %v620_v29 = vld [vmem:[%s2368_s5 + $0x8] sm:$0xff]  ;;  %v619_v30 = vld [vmem:[%s2368_s5] sm:$0xff]  ;;  %v991_v44 = vld [vmem:[%s2371_s9 + $0x70] sm:$0xff] }
  0x1a   :  { %1581 = vmatpush3.msra.mxu0 %v1341_v34  ;;  %1592 = vmatprep.mubr.msk.f32.mxu0 %vm154_vm1, %v121_v36  ;;  %v1348_v46 = vld [vmem:[%s2369_s4] ss:$0 sm:$0xff]  ;;  %v1377_v25 = vld [vmem:[%s2368_s5 + $0x128] sm:$0xff] }
  0x1b   :  { %1582 = vmatprep.subr.mxu0 %v1340_v38  ;;  %1608 = vmatprep.subr.mxu1 %v1368_v59  ;;  %v1380_v19 = vld [vmem:[%s2368_s5 + $0x140] sm:$0xff]  ;;  %v990_v51 = vld [vmem:[%s2371_s9 + $0x68] sm:$0xff] }
  0x1c   :  { %1583 = vmatpush3.msra.mxu0 %v1340_v38  ;;  %1609 = vmatpush3.msra.mxu1 %v1368_v59 }
  0x1d   :  { %1584 = vmatprep.subr.mxu0 %v1339_v39  ;;  %1610 = vmatprep.subr.mxu1 %v1367_v60 }
  0x1e   :  { %1585 = vmatpush3.msra.mxu0 %v1339_v39  ;;  %1611 = vmatpush3.msra.mxu1 %v1367_v60 }
  0x1f   :  { %1586 = vmatprep.subr.mxu0 %v1338_v42  ;;  %1612 = vmatprep.subr.mxu1 %v1366_v61 }
  0x20   :  { %1587 = vmatpush3.msra.mxu0 %v1338_v42  ;;  %1613 = vmatpush3.msra.mxu1 %v1366_v61 }
  0x21   :  { %1588 = vmatprep.subr.mxu0 %v1337_v43  ;;  %1614 = vmatprep.subr.mxu1 %v1365_v63 }
  0x22   :  { %1589 = vmatpush3.msra.mxu0 %v1337_v43  ;;  %1615 = vmatpush3.msra.mxu1 %v1365_v63 }
  0x23   :  { %1590 = vmatprep.subr.mxu0 %v1336_v47  ;;  %1616 = vmatprep.subr.mxu1 %v1364_v1 }
  0x24   :  { %1591 = vmatpush3.msra.mxu0 %v1336_v47  ;;  %1617 = vmatpush3.msra.mxu1 %v1364_v1 }
  0x25   :  { %1593 = vmatmul.mubr.msk.f32.vlgmr.msra.gmra.mxu0 %vm154_vm1, %v134_v48  ;;  %1598 = vmatprep.subr.msk.mxu0 %vm488_vm4, %v474_v49 }
  0x26   :  { %1599 = vmatpush3.msk.msra.mxu0 %vm488_vm4, %v474_v49  ;;  %1595 = vmatprep.mubr.msk.f32.mxu0 %vm154_vm1, %v123_v50 }
  0x27   :  { %1644 = vmatprep.subr.mxu0 %v634_v62  ;;  %1618 = vmatprep.subr.mxu1 %v1363_v4 }
  0x28   :  { %1619 = vmatpush3.msra.mxu1 %v1363_v4 }
  0x29   :  { %1596 = vmatmul.mubr.msk.f32.gmra.mxu0 %vm154_vm1, %v136_v53  ;;  %1620 = vmatprep.subr.mxu1 %v1362_v5 }
  0x2a   :  { %1600 = vmatprep.mubr.msk.f32.mxu0 %vm475_vm6, %v470_v54  ;;  %1621 = vmatpush3.msra.mxu1 %v1362_v5 }
  0x2b   :  { %1622 = vmatprep.subr.mxu1 %v1361_v6 }
  0x2c   :  { %1623 = vmatpush3.msra.mxu1 %v1361_v6 }
  0x2d   :  { %1601 = vmatmul.mubr.msk.f32.vlgmr.msra.gmra.mxu0 %vm475_vm6, %v471_v55  ;;  %1624 = vmatprep.subr.mxu1 %v1360_v9 }
  0x2e   :  { %1603 = vmatprep.mubr.msk.f32.mxu0 %vm475_vm6, %v472_v56  ;;  %1645 = vmatpush3.msra.mxu0 %v634_v62 }
  0x2f   :  { %1646 = vmatprep.subr.mxu0 %v633_v0  ;;  %1625 = vmatpush3.msra.mxu1 %v1360_v9 }
  0x30   :  { %1647 = vmatpush3.msra.mxu0 %v633_v0  ;;  %1626 = vmatprep.subr.mxu1 %v1359_v11 }
  0x31   :  { %1604 = vmatmul.mubr.msk.f32.gmra.mxu0 %vm475_vm6, %v473_v57  ;;  %1648 = vmatprep.subr.mxu0 %v632_v2 }
  0x32   :  { %1649 = vmatpush3.msra.mxu0 %v632_v2  ;;  %1627 = vmatpush3.msra.mxu1 %v1359_v11  ;;  %v1385_v11 = vld [vmem:[%s2368_s5 + $0x168] sm:$0xff] }
  0x33   :  { %1650 = vmatprep.subr.mxu0 %v631_v3  ;;  %1628 = vmatprep.subr.mxu1 %v1358_v13 }
  0x34   :  { %1651 = vmatpush3.msra.mxu0 %v631_v3  ;;  %1629 = vmatpush3.msra.mxu1 %v1358_v13  ;;  %v1384_v13 = vld [vmem:[%s2368_s5 + $0x160] sm:$0xff] }
  0x35   :  { %1652 = vmatprep.subr.mxu0 %v630_v8  ;;  %1630 = vmatprep.subr.mxu1 %v1357_v15 }
  0x36   :  { %1653 = vmatpush3.msra.mxu0 %v630_v8  ;;  %1631 = vmatpush3.msra.mxu1 %v1357_v15  ;;  %v1386_v8 = vld [vmem:[%s2368_s5 + $0x170] sm:$0xff] }
  0x37   :  { %1654 = vmatprep.subr.mxu0 %v629_v10  ;;  %1632 = vmatprep.subr.mxu1 %v1356_v17 }
  0x38   :  { %1655 = vmatpush3.msra.mxu0 %v629_v10  ;;  %1633 = vmatpush3.msra.mxu1 %v1356_v17 }
  0x39   :  { %1656 = vmatprep.subr.mxu0 %v628_v12  ;;  %1634 = vmatprep.subr.mxu1 %v1355_v20 }
  0x3a   :  { %1657 = vmatpush3.msra.mxu0 %v628_v12  ;;  %1635 = vmatpush3.msra.mxu1 %v1355_v20  ;;  %v1381_v20 = vld [vmem:[%s2368_s5 + $0x148] sm:$0xff] }
  0x3b   :  { %1658 = vmatprep.subr.mxu0 %v627_v14  ;;  %1636 = vmatprep.subr.mxu1 %v1354_v22 }
  0x3c   :  { %1659 = vmatpush3.msra.mxu0 %v627_v14  ;;  %1637 = vmatpush3.msra.mxu1 %v1354_v22  ;;  %v1383_v14 = vld [vmem:[%s2368_s5 + $0x158] sm:$0xff] }
  0x3d   :  { %1660 = vmatprep.subr.mxu0 %v626_v16  ;;  %1682 = vmatprep.subr.mxu1 %v2123_v24 }
  0x3e   :  { %1661 = vmatpush3.msra.mxu0 %v626_v16 }
  0x3f   :  { %1662 = vmatprep.subr.mxu0 %v625_v18 }
  0x40   :  { %1663 = vmatpush3.msra.mxu0 %v625_v18  ;;  %v1382_v18 = vld [vmem:[%s2368_s5 + $0x150] sm:$0xff] }
  0x41   :  { %1664 = vmatprep.subr.mxu0 %v624_v21 }
  0x42   :  { %1665 = vmatpush3.msra.mxu0 %v624_v21 }
  0x43   :  { %1666 = vmatprep.subr.mxu0 %v623_v23 }
  0x44   :  { %1667 = vmatpush3.msra.mxu0 %v623_v23  ;;  %v1379_v23 = vld [vmem:[%s2368_s5 + $0x138] sm:$0xff] }
  0x45   :  { %1668 = vmatprep.subr.mxu0 %v622_v26 }
  0x46   :  { %1669 = vmatpush3.msra.mxu0 %v622_v26  ;;  %v1376_v26 = vld [vmem:[%s2368_s5 + $0x120] sm:$0xff] }
  0x47   :  { %1670 = vmatprep.subr.mxu0 %v621_v28 }
  0x48   :  { %1671 = vmatpush3.msra.mxu0 %v621_v28  ;;  %v1375_v28 = vld [vmem:[%s2368_s5 + $0x118] sm:$0xff] }
  0x49   :  { %1672 = vmatprep.subr.mxu0 %v620_v29 }
  0x4a   :  { %1673 = vmatpush3.msra.mxu0 %v620_v29  ;;  %v1374_v29 = vld [vmem:[%s2368_s5 + $0x110] sm:$0xff] }
  0x4b   :  { %1674 = vmatprep.subr.mxu0 %v619_v30 }
  0x4c   :  { %1675 = vmatpush3.msra.mxu0 %v619_v30  ;;  %v1373_v30 = vld [vmem:[%s2368_s5 + $0x108] sm:$0xff] }
  0x4d   :  { %1720 = vmatprep.subr.mxu0 %v1804_v27 }
  0xd3   :  { %v1550_v31 = vpop.f32.mrf.mxu0 }
  0xd4   :  { %v1572_v33 = vpop.f32.mrf.mxu1 }
  0xd5   :  { %v233_v32 = vpop.f32.mrf.mxu0  ;;  %v336_v39 = vadd.f32 %v1572_v33, %v1550_v31  ;;  %v1372_v31 = vld [vmem:[%s2368_s5 + $0x100] sm:$0xff] }
  0xd6   :  { %v330_v35 = vpop.f32.mrf.mxu1 }
  0xd7   :  { %v331_v41 = vadd.f32 %v330_v35, %v233_v32  ;;  %v992_v35 = vld [vmem:[%s2371_s9 + $0x78] sm:$0xff] }
  0xd8   :  { %v1575_v37 = vpop.f32.mrf.mxu1 }
  0xd9   :  { %v1553_v34 = vpop.f32.mrf.mxu0 }
  0xda   :  { %v340_v42 = vpop.f32.mrf.mxu1  ;;  %v346_v47 = vadd.f32 %v1575_v37, %v1553_v34  ;;  %v988_v37 = vld [vmem:[%s2371_s9 + $0x58] sm:$0xff] }
  0xdb   :  { %v243_v36 = vpop.f32.mrf.mxu0 }
  0xdc   :  { %v341_v49 = vadd.f32 %v340_v42, %v243_v36  ;;  %v989_v36 = vld [vmem:[%s2371_s9 + $0x60] sm:$0xff]  ;;  %v983_v42 = vld [vmem:[%s2371_s9 + $0x30] sm:$0xff] }
  0xe5   :  { %v1594_v38 = vpop.f32.mrf.mxu0 }
  0xe6   :  { %v456_v43 = vadd.f32 %v1594_v38, %v336_v39  ;;  %v987_v38 = vld [vmem:[%s2371_s9 + $0x50] sm:$0xff]  ;;  %v986_v39 = vld [vmem:[%s2371_s9 + $0x48] sm:$0xff] }
  0xe7   :  { %v436_v40 = vpop.f32.mrf.mxu0 }
  0xe8   :  { %v455_v48 = vadd.f32 %v436_v40, %v331_v41  ;;  %v467_v53 = vadd.f32 %v1348_v46, %v456_v43  ;;  %v985_v40 = vld [vmem:[%s2371_s9 + $0x40] sm:$0xff]  ;;  %v984_v41 = vld [vmem:[%s2371_s9 + $0x38] sm:$0xff]  ;;  %v982_v43 = vld [vmem:[%s2371_s9 + $0x28] sm:$0xff] }
  0xe9   :  { %v1597_v45 = vpop.f32.mrf.mxu0 }
  0xea   :  { %v458_v52 = vadd.f32 %v1597_v45, %v346_v47  ;;  %v466_v57 = vadd.f32 %v1348_v46, %v455_v48  ;;  %v981_v45 = vld [vmem:[%s2371_s9 + $0x20] sm:$0xff]  ;;  %v979_v47 = vld [vmem:[%s2371_s9 + $0x10] sm:$0xff]  ;;  %v978_v48 = vld [vmem:[%s2371_s9 + $0x8] sm:$0xff] }
  0xeb   :  { %v446_v50 = vpop.f32.mrf.mxu0 }
  0xec   :  { %v457_v54 = vadd.f32 %v446_v50, %v341_v49  ;;  %v469_v60 = vadd.f32 %v1348_v46, %v458_v52  ;;  %v977_v49 = vld [vmem:[%s2371_s9] sm:$0xff] }
  0xed   :  { %v1602_v55 = vpop.f32.mrf.mxu0 }
  0xee   :  { %v2144_v56 = vadd.f32 %v1602_v55, %v467_v53  ;;  %v468_v63 = vadd.f32 %v1348_v46, %v457_v54  ;;  %v980_v46 = vld [vmem:[%s2371_s9 + $0x18] sm:$0xff] }
  0xef   :  { %v558_v58 = vpop.f32.mrf.mxu0 }
  0xf0   :  { %582 = vst [vmem:[%s2370_s12 + $0x8] sm:$0xff] %v2144_v56  ;;  %v2150_v59 = vadd.f32 %v558_v58, %v466_v57  ;;  %vm586_vm7 = vcmp.gt.f32.partialorder %v2144_v56, 0.0  ;;  %v590_v61 = vmul.f32 0.2, %v2144_v56 }
  0xf1   :  { %v1605_v62 = vpop.f32.mrf.mxu0 }
  0xf2   :  { %581 = vst [vmem:[%s2370_s12] sm:$0xff] %v2150_v59  ;;  %v2158_v0 = vadd.f32 %v1605_v62, %v469_v60  ;;  %vm585_vm8 = vcmp.gt.f32.partialorder %v2150_v59, 0.0  ;;  %v589_v1 = vmul.f32 0.2, %v2150_v59  ;;  %v594_v2 = vsel %vm586_vm7, %v2144_v56, %v590_v61  ;;  %v1390_v62 = vld [vmem:[%s2372_s6] ss:$0 sm:$0xff] }
  0xf3   :  { %v568_v3 = vpop.f32.mrf.mxu0  ;;  %600 = vst [vmem:[#allocation2 + $0x9] sm:$0xff] %v594_v2 }
  0xf4   :  { %584 = vst [vmem:[%s2370_s12 + $0x18] sm:$0xff] %v2158_v0  ;;  %v2167_v4 = vadd.f32 %v568_v3, %v468_v63  ;;  %v593_v5 = vsel %vm585_vm8, %v2150_v59, %v589_v1  ;;  %vm588_vm9 = vcmp.gt.f32.partialorder %v2158_v0, 0.0  ;;  %v592_v6 = vmul.f32 0.2, %v2158_v0 }
  0xf5   :  { %599 = vst [vmem:[#allocation2 + $0x1] sm:$0xff] %v593_v5  ;;  %1638 = vmatprep.mubr.f32.mxu1 %v593_v5 }
  0xf6   :  { %583 = vst [vmem:[%s2370_s12 + $0x10] sm:$0xff] %v2167_v4  ;;  %1639 = vmatmul.mubr.f32.vlgmr.msra.gmra.mxu1 %v594_v2  ;;  %vm587_vm10 = vcmp.gt.f32.partialorder %v2167_v4, 0.0  ;;  %v591_v9 = vmul.f32 0.2, %v2167_v4  ;;  %v596_v10 = vsel %vm588_vm9, %v2158_v0, %v592_v6 }
  0xf7   :  { %1683 = vmatpush3.msra.mxu1 %v2123_v24  ;;  %602 = vst [vmem:[#allocation2 + $0x19] sm:$0xff] %v596_v10  ;;  %v1378_v24 = vld [vmem:[%s2368_s5 + $0x130] sm:$0xff] }
  0xf8   :  { %1684 = vmatprep.subr.mxu1 %v1386_v8  ;;  %v595_v12 = vsel %vm587_vm10, %v2167_v4, %v591_v9 }
  0xf9   :  { %1685 = vmatpush3.msra.mxu1 %v1386_v8  ;;  %601 = vst [vmem:[#allocation2 + $0x11] sm:$0xff] %v595_v12  ;;  %1641 = vmatprep.mubr.f32.mxu1 %v595_v12 }
  0xfa   :  { %1686 = vmatprep.subr.mxu1 %v1385_v11  ;;  %1642 = vmatmul.mubr.f32.gmra.mxu1 %v596_v10 }
  0xfb   :  { %1687 = vmatpush3.msra.mxu1 %v1385_v11 }
  0xfc   :  { %1688 = vmatprep.subr.mxu1 %v1384_v13  ;;  %v603_v15 = vld [vmem:[#allocation2] sm:$0xff]  ;;  %v604_v17 = vld [vmem:[#allocation2 + $0x8] sm:$0xff] }
  0xfd   :  { %v611_v16 = vld [vmem:[#allocation2 + $0x2] sm:$0xff]  ;;  %1689 = vmatpush3.msra.mxu1 %v1384_v13  ;;  %1676 = vmatprep.mubr.msk.f32.mxu0 %vm1917_vm0, %v603_v15  ;;  %vm1145_vm0 = vcmask 64512  }
  0xfe   :  { %1690 = vmatprep.subr.mxu1 %v1383_v14  ;;  %1714 = vmatprep.mubr.f32.mxu1 %v611_v16  ;;  %v614_v34 = vld [vmem:[#allocation2 + $0x1a] sm:$0xff] }
  0xff   :  { %1677 = vmatmul.mubr.f32.vlgmr.msra.gmra.mxu0 %v604_v17  ;;  %1691 = vmatpush3.msra.mxu1 %v1383_v14 }
 0x100   :  { %1692 = vmatprep.subr.mxu1 %v1382_v18  ;;  %v605_v21 = vld [vmem:[#allocation2 + $0x10] sm:$0xff]  ;;  %v606_v22 = vld [vmem:[#allocation2 + $0x18] sm:$0xff]  ;;  %1721 = vmatpush3.msra.mxu0 %v992_v35 }
 0x101   :  { %1693 = vmatpush3.msra.mxu1 %v1382_v18  ;;  %1679 = vmatprep.mubr.msk.f32.mxu0 %vm1935_vm2, %v605_v21  ;;  %v612_v32 = vld [vmem:[#allocation2 + $0xa] sm:$0xff]  ;;  %v613_v33 = vld [vmem:[#allocation2 + $0x12] sm:$0xff] }
 0x102   :  { %1694 = vmatprep.subr.mxu1 %v1381_v20  ;;  %1722 = vmatprep.subr.mxu0 %v1804_v27 }
 0x103   :  { %1680 = vmatmul.mubr.f32.gmra.mxu0 %v606_v22  ;;  %1695 = vmatpush3.msra.mxu1 %v1381_v20 }
 0x104   :  { %1696 = vmatprep.subr.mxu1 %v1380_v19  ;;  %1723 = vmatpush3.msra.mxu0 %v991_v44 }
 0x105   :  { %1697 = vmatpush3.msra.mxu1 %v1380_v19  ;;  %1724 = vmatprep.subr.mxu0 %v1804_v27 }
 0x106   :  { %1698 = vmatprep.subr.mxu1 %v1379_v23  ;;  %1725 = vmatpush3.msra.mxu0 %v990_v51 }
 0x107   :  { %1699 = vmatpush3.msra.mxu1 %v1379_v23  ;;  %1726 = vmatprep.subr.mxu0 %v1804_v27 }
 0x108   :  { %1700 = vmatprep.subr.mxu1 %v1378_v24  ;;  %1727 = vmatpush3.msra.mxu0 %v989_v36 }
 0x109   :  { %1701 = vmatpush3.msra.mxu1 %v1378_v24  ;;  %1728 = vmatprep.subr.mxu0 %v1804_v27 }
 0x10a   :  { %1702 = vmatprep.subr.mxu1 %v1377_v25  ;;  %1729 = vmatpush3.msra.mxu0 %v988_v37 }
 0x10b   :  { %1703 = vmatpush3.msra.mxu1 %v1377_v25  ;;  %1730 = vmatprep.subr.mxu0 %v1804_v27 }
 0x10c   :  { %1704 = vmatprep.subr.mxu1 %v1376_v26  ;;  %1731 = vmatpush3.msra.mxu0 %v987_v38 }
 0x10d   :  { %1705 = vmatpush3.msra.mxu1 %v1376_v26  ;;  %1732 = vmatprep.subr.mxu0 %v1804_v27 }
 0x10e   :  { %1706 = vmatprep.subr.mxu1 %v1375_v28  ;;  %1733 = vmatpush3.msra.mxu0 %v986_v39 }
 0x10f   :  { %1707 = vmatpush3.msra.mxu1 %v1375_v28  ;;  %1734 = vmatprep.subr.mxu0 %v1804_v27 }
 0x110   :  { %1708 = vmatprep.subr.mxu1 %v1374_v29  ;;  %1735 = vmatpush3.msra.mxu0 %v985_v40 }
 0x111   :  { %1709 = vmatpush3.msra.mxu1 %v1374_v29  ;;  %1736 = vmatprep.subr.mxu0 %v1804_v27 }
 0x112   :  { %1710 = vmatprep.subr.mxu1 %v1373_v30  ;;  %1737 = vmatpush3.msra.mxu0 %v984_v41 }
 0x113   :  { %1711 = vmatpush3.msra.mxu1 %v1373_v30  ;;  %1738 = vmatprep.subr.mxu0 %v1804_v27 }
 0x114   :  { %1712 = vmatprep.subr.mxu1 %v1372_v31  ;;  %1739 = vmatpush3.msra.mxu0 %v983_v42 }
 0x115   :  { %1713 = vmatpush3.msra.mxu1 %v1372_v31  ;;  %1740 = vmatprep.subr.mxu0 %v1804_v27 }
 0x116   :  { %1715 = vmatmul.mubr.msk.f32.vlgmr.msra.gmra.mxu1 %vm1994_vm3, %v612_v32  ;;  %1755 = vmatprep.subr.mxu1 %v1804_v27 }
 0x117   :  { %1717 = vmatprep.mubr.f32.mxu1 %v613_v33  ;;  %1756 = vmatpush3.msra.mxu1 %v992_v35 }
 0x118   :  { %1757 = vmatprep.subr.mxu1 %v1804_v27  ;;  %1741 = vmatpush3.msra.mxu0 %v982_v43 }
 0x119   :  { %1758 = vmatpush3.msra.mxu1 %v991_v44  ;;  %1742 = vmatprep.subr.mxu0 %v1804_v27 }
 0x11a   :  { %1718 = vmatmul.mubr.msk.f32.gmra.mxu1 %vm2012_vm5, %v614_v34  ;;  %1759 = vmatprep.subr.mxu1 %v1804_v27 }
 0x11b   :  { %1760 = vmatpush3.msra.mxu1 %v990_v51  ;;  %1743 = vmatpush3.msra.mxu0 %v981_v45 }
 0x11c   :  { %1761 = vmatprep.subr.mxu1 %v1804_v27  ;;  %1744 = vmatprep.subr.mxu0 %v1804_v27 }
 0x11d   :  { %1762 = vmatpush3.msra.mxu1 %v989_v36  ;;  %1745 = vmatpush3.msra.mxu0 %v980_v46 }
 0x11e   :  { %1763 = vmatprep.subr.mxu1 %v1804_v27  ;;  %1746 = vmatprep.subr.mxu0 %v1804_v27 }
 0x11f   :  { %1764 = vmatpush3.msra.mxu1 %v988_v37  ;;  %1747 = vmatpush3.msra.mxu0 %v979_v47 }
 0x120   :  { %1765 = vmatprep.subr.mxu1 %v1804_v27  ;;  %1748 = vmatprep.subr.mxu0 %v1804_v27 }
 0x121   :  { %1766 = vmatpush3.msra.mxu1 %v987_v38  ;;  %1749 = vmatpush3.msra.mxu0 %v978_v48 }
 0x122   :  { %1767 = vmatprep.subr.mxu1 %v1804_v27  ;;  %1752 = vmatprep.mubr.msk.f32.mxu0 %vm1805_vm11, %v1804_v27 }
 0x123   :  { %1768 = vmatpush3.msra.mxu1 %v986_v39  ;;  %1750 = vmatprep.subr.mxu0 %v1804_v27 }
 0x124   :  { %1769 = vmatprep.subr.mxu1 %v1804_v27  ;;  %1751 = vmatpush3.msra.mxu0 %v977_v49 }
 0x125   :  { %1770 = vmatpush3.msra.mxu1 %v985_v40  ;;  %1787 = vmatprep.mubr.msk.f32.mxu1 %vm1805_vm11, %v1804_v27 }
 0x126   :  { %1771 = vmatprep.subr.mxu1 %v1804_v27  ;;  %1790 = vmatprep.subr.mxu0 %v1804_v27 }
 0x127   :  { %1772 = vmatpush3.msra.mxu1 %v984_v41 }
 0x128   :  { %1773 = vmatprep.subr.mxu1 %v1804_v27 }
 0x129   :  { %1774 = vmatpush3.msra.mxu1 %v983_v42 }
 0x12a   :  { %1775 = vmatprep.subr.mxu1 %v1804_v27 }
 0x12b   :  { %1776 = vmatpush3.msra.mxu1 %v982_v43 }
 0x12c   :  { %1777 = vmatprep.subr.mxu1 %v1804_v27 }
 0x12d   :  { %1778 = vmatpush3.msra.mxu1 %v981_v45 }
 0x12e   :  { %1779 = vmatprep.subr.mxu1 %v1804_v27 }
 0x12f   :  { %1780 = vmatpush3.msra.mxu1 %v980_v46 }
 0x130   :  { %1781 = vmatprep.subr.mxu1 %v1804_v27 }
 0x131   :  { %1782 = vmatpush3.msra.mxu1 %v979_v47  ;;  %v1144_v47 = vld [vmem:[%s2373_s10] sm:$0xff] }
 0x132   :  { %1783 = vmatprep.subr.mxu1 %v1804_v27 }
 0x133   :  { %1784 = vmatpush3.msra.mxu1 %v978_v48 }
 0x134   :  { %1785 = vmatprep.subr.mxu1 %v1804_v27 }
 0x135   :  { %1786 = vmatpush3.msra.mxu1 %v977_v49 }
 0x1b6   :  { %v1640_v50 = vpop.f32.mrf.mxu1 }
 0x1b8   :  { %v718_v52 = vpop.f32.mrf.mxu1 }
 0x1ba   :  { %v1643_v54 = vpop.f32.mrf.mxu1 }
 0x1bc   :  { %v728_v57 = vpop.f32.mrf.mxu1 }
 0x1bf   :  { %v1678_v53 = vpop.f32.mrf.mxu0 }
 0x1c0   :  { %v809_v58 = vadd.f32 %v1678_v53, %v1640_v50 }
 0x1c1   :  { %v803_v55 = vpop.f32.mrf.mxu0 }
 0x1c2   :  { %v804_v63 = vadd.f32 %v803_v55, %v718_v52 }
 0x1c3   :  { %v1681_v60 = vpop.f32.mrf.mxu0 }
 0x1c4   :  { %v819_v3 = vadd.f32 %v1681_v60, %v1643_v54  ;;  %v1139_v60 = vld [vmem:[%s2374_s7] sm:$0x1] }
 0x1c5   :  { %v813_v5 = vpop.f32.mrf.mxu0 }
 0x1c6   :  { %v814_v13 = vadd.f32 %v813_v5, %v728_v57 }
 0x1d6   :  { %v1716_v61 = vpop.f32.mrf.mxu1 }
 0x1d7   :  { %v925_v1 = vadd.f32 %v1716_v61, %v809_v58 }
 0x1d8   :  { %v905_v2 = vpop.f32.mrf.mxu1 }
 0x1d9   :  { %v936_v6 = vadd.f32 %v1390_v62, %v925_v1  ;;  %v924_v8 = vadd.f32 %v905_v2, %v804_v63  ;;  %v1141_v63 = vld [vmem:[%s2375_s8] sm:$0x1] }
 0x1da   :  { %v1719_v9 = vpop.f32.mrf.mxu1 }
 0x1db   :  { %v940_v10 = vadd.f32 %v936_v6, %v2144_v56  ;;  %v935_v11 = vadd.f32 %v1390_v62, %v924_v8  ;;  %v927_v12 = vadd.f32 %v1719_v9, %v819_v3  ;;  %v1294_v3 = vsub.s32 0, %v1889_v7 }
 0x1dc   :  { %v915_v14 = vpop.f32.mrf.mxu1 }
 0x1dd   :  { %v939_v15 = vadd.f32 %v935_v11, %v2150_v59  ;;  %v938_v16 = vadd.f32 %v1390_v62, %v927_v12  ;;  %v948_v17 = vmul.f32 0.2, %v940_v10  ;;  %v926_v18 = vadd.f32 %v915_v14, %v814_v13 }
 0x1de   :  { %vm944_vm12 = vcmp.gt.f32.partialorder %v940_v10, 0.0 }
 0x1df   :  { %vm943_vm13 = vcmp.gt.f32.partialorder %v939_v15, 0.0  ;;  %v947_v20 = vmul.f32 0.2, %v939_v15  ;;  %v942_v21 = vadd.f32 %v938_v16, %v2158_v0  ;;  %v937_v22 = vadd.f32 %v1390_v62, %v926_v18 }
 0x1e0   :  { %v2326_v23 = vsel %vm944_vm12, %v940_v10, %v948_v17 }
 0x1e1   :  { %v2324_v19 = vsel %vm943_vm13, %v939_v15, %v947_v20  ;;  %v950_v56 = vmul.f32 0.2, %v942_v21  ;;  %v941_v24 = vadd.f32 %v937_v22, %v2167_v4  ;;  %vm946_vm14 = vcmp.gt.f32.partialorder %v942_v21, 0.0 }
 0x1e2   :  { %v964_v25 = vmul.f32 %v2324_v19, %v2324_v19  ;;  %v965_v26 = vmul.f32 %v2326_v23, %v2326_v23  ;;  %v955_v0 = vadd.f32 %v2326_v23, %v2324_v19 }
 0x1e3   :  { %vm945_vm15 = vcmp.gt.f32.partialorder %v941_v24, 0.0  ;;  %v949_v59 = vmul.f32 0.2, %v941_v24  ;;  %v954_v28 = vsel %vm946_vm14, %v942_v21, %v950_v56 }
 0x1e4   :  { %v968_v30 = vadd.f32 %v965_v26, %v964_v25  ;;  %v967_v33 = vmul.f32 %v954_v28, %v954_v28 }
 0x1e5   :  { %v953_v29 = vsel %vm945_vm15, %v941_v24, %v949_v59 }
 0x1e6   :  { %v956_v31 = vadd.f32 %v955_v0, %v953_v29  ;;  %v966_v32 = vmul.f32 %v953_v29, %v953_v29 }
 0x1e8   :  { %v957_v34 = vadd.f32 %v956_v31, %v954_v28  ;;  %v969_v4 = vadd.f32 %v968_v30, %v966_v32 }
 0x1ea   :  { %v958_v35 = vrot.slane %v957_v34, 4  ;;  %v970_v44 = vadd.f32 %v969_v4, %v967_v33 }
 0x1ec   :  { %v959_v51 = vadd.f32 %v958_v35, %v957_v34  ;;  %v971_v36 = vrot.slane %v970_v44, 4 }
 0x1ee   :  { %v960_v37 = vrot.slane %v959_v51, 2  ;;  %v972_v38 = vadd.f32 %v971_v36, %v970_v44 }
 0x1f0   :  { %v961_v39 = vadd.f32 %v960_v37, %v959_v51  ;;  %v973_v40 = vrot.slane %v972_v38, 2 }
 0x1f2   :  { %v962_v41 = vrot.slane %v961_v39, 1  ;;  %v974_v42 = vadd.f32 %v973_v40, %v972_v38 }
 0x1f4   :  { %v963_v43 = vadd.f32 %v962_v41, %v961_v39  ;;  %v975_v45 = vrot.slane %v974_v42, 1 }
 0x1f6   :  { %1753 = vmatmul.mubr.f32.vlgmr.msra.gmra.mxu0 %v963_v43  ;;  %v976_v46 = vadd.f32 %v975_v45, %v974_v42 }
 0x1f7   :  { %1792 = vmatprep.mubr.msk.f32.mxu0 %vm1805_vm11, %v1804_v27  ;;  %1791 = vmatpush3.msra.mxu0 %v1144_v47 }
 0x1f8   :  { %1788 = vmatmul.mubr.f32.vlgmr.msra.gmra.mxu1 %v976_v46  ;;  %1795 = vmatprep.subr.mxu0 %v1804_v27 }
 0x2b6   :  { %v1059_v48 = vpop.f32.mrf.mxu0 }
 0x2b7   :  { %v1133_v49 = vmul.f32 0.001953125, %v1059_v48 }
 0x2b8   :  { %v1754_v50 = vpop.f32.mrf.mxu0  ;;  %v1129_v52 = vpop.f32.mrf.mxu1 }
 0x2b9   :  { %v1135_v53 = vmul.f32 %v1133_v49, %v1133_v49  ;;  %v1134_v54 = vmul.f32 0.001953125, %v1129_v52 }
 0x2ba   :  { %v1789_v55 = vpop.f32.mrf.mxu1 }
 0x2bb   :  { %v1136_v57 = vsub.f32 %v1134_v54, %v1135_v53 }
 0x2bd   :  { %v1137_v58 = vadd.f32 1e-05, %v1136_v57 }
 0x2bf   :  { %1802 = vrsqrt.f32 %v1137_v58 }
 0x2cc   :  { %v1803_v61 = vpop.eup %1802 }
 0x2cd   :  { %v1140_v62 = vmul.f32 %v1803_v61, %v1139_v60 }
 0x2cf   :  { %1793 = vmatmul.mubr.msk.f32.vlgmr.msra.gmra.mxu0 %vm1145_vm0, %v1140_v62  ;;  %v1142_v1 = vmul.f32 %v1140_v62, %v1133_v49 }
 0x2d0   :  { %1796 = vmatpush3.msra.mxu0 %v1144_v47  ;;  %1797 = vmatprep.mubr.msk.f32.mxu0 %vm1805_vm11, %v1804_v27 }
 0x2d1   :  { %v1143_v2 = vsub.f32 %v1141_v63, %v1142_v1 }
 0x2d3   :  { %1798 = vmatmul.mubr.msk.f32.vlgmr.msra.gmra.mxu0 %vm1145_vm0, %v1143_v2 }
 0x38f   :  { %v1215_v5 = vpop.f32.mrf.mxu0 }
 0x390   :  { %v1295_v6 = vrot.slane %v1215_v5, %v1294_v3 }
 0x391   :  { %v1794_v8 = vpop.f32.mrf.mxu0 }
 0x392   :  { %v1296_v9 = vmul.f32 %v1295_v6, %v2324_v19  ;;  %v1297_v11 = vmul.f32 %v1295_v6, %v2326_v23  ;;  %v1298_v12 = vmul.f32 %v1295_v6, %v953_v29  ;;  %v1299_v13 = vmul.f32 %v1295_v6, %v954_v28 }
 0x393   :  { %v1288_v10 = vpop.f32.mrf.mxu0 }
 0x394   :  { %v1303_v14 = vrot.slane %v1288_v10, %v1294_v3 }
 0x395   :  { %v1799_v15 = vpop.f32.mrf.mxu0 }
 0x396   :  { %v1304_v16 = vadd.f32 %v1303_v14, %v1296_v9  ;;  %v1305_v17 = vadd.f32 %v1303_v14, %v1297_v11  ;;  %v1306_v18 = vadd.f32 %v1303_v14, %v1298_v12  ;;  %v1307_v27 = vadd.f32 %v1303_v14, %v1299_v13 }
 0x398   :  { %1308 = vst [vmem:[%s2376_s11] sm:$0xff] %v1304_v16  ;;  %1309 = vst [vmem:[%s2376_s11 + $0x8] sm:$0xff] %v1305_v17 }
 0x399   :  { %1310 = vst [vmem:[%s2376_s11 + $0x10] sm:$0xff] %v1306_v18  ;;  %1311 = vst [vmem:[%s2376_s11 + $0x18] sm:$0xff] %v1307_v27 }

</bundles_post_ra>
